<compile_context>
chip_gen: v6e
topology: v6e:2x2x1
jax: 0.10.0
libtpu: 0.0.40
codegen_flags: <defaults>
</compile_context>

<pallas_src>
import functools

import jax
import jax.numpy as jnp
from jax import lax
from jax.experimental import pallas as pl
from jax.experimental.pallas import tpu as pltpu

# Row indices of the packed per-channel parameter tensor `vec` (shape (12, Cp, 1)).
B3, GS, GB, LNG, LNB, BE, ES, EB, BF, FS, FB, CM = range(12)
NUM_VEC = 12

_SOBEL_X = (-1., 0., 1., -2., 0., 2., -1., 0., 1.)
_SOBEL_Y = (-1., -2., -1., 0., 0., 0., 1., 2., 1.)
_EPS = 1e-5


def glfi_kernel(xr_ref, mask9_ref, w3_ref, we1_ref, we2_ref, wf1_ref, wf2_ref,
                vec_ref, o_ref, *, H, W, Wp, C):
    """One batch element of GLFI.forward (padded-row flattened spatial layout)."""
    Cp = o_ref.shape[1]
    NP = o_ref.shape[2]
    inv_hw = 1.0 / float(H * W)
    inv_c = 1.0 / float(C)

    xr = xr_ref[0]            # (Cp, NP) reflect-padded input, flattened padded grid
    mask = mask9_ref[4]       # (1, NP)  interior mask (center tap = unshifted)

    def shifted(v, off):
        # shifted[p] = v[p + off]; interior output positions never wrap.
        return v if off == 0 else pltpu.roll(v, shift=(-off) % NP, axis=1)

    # ---- instance-norm stats (two-pass, interior-masked) --------------------
    xm = xr * mask                                              # zero-pad copy
    m = jnp.sum(xm, axis=1, keepdims=True) * inv_hw             # (Cp, 1)
    diff = xr - m
    var = jnp.sum(diff * diff * mask, axis=1, keepdims=True) * inv_hw
    inv = lax.rsqrt(var + _EPS)
    xn = diff * inv                                             # instance-normed x

    # ---- fused 3x3-conv + Sobel tap loop ------------------------------------
    # One big roll of xr per tap.  Zero-pad conv taps are reconstructed as
    # xt * mask9[t] (interior of zero/reflect pads agree; ring & lane tail are
    # masked to exact zeros).  Sobel stencils sum to zero, so the (-m) term of
    # the normalization cancels; 1/std is applied once after accumulation.
    g = None
    ex = None
    ey = None
    for t in range(9):
        dy, dx = t // 3, t % 3
        off = (dy - 1) * Wp + (dx - 1)
        xt = shifted(xr, off)
        tap0 = xm if off == 0 else xt * mask9_ref[t]
        gt = jnp.dot(w3_ref[t], tap0, preferred_element_type=jnp.float32)
        g = gt if g is None else g + gt
        sx, sy = _SOBEL_X[t], _SOBEL_Y[t]
        if sx != 0.0:
            tx = sx * xt
            ex = tx if ex is None else ex + tx
        if sy != 0.0:
            ty = sy * xt
            ey = ty if ey is None else ey + ty

    # ---- global_conv: conv bias + folded BN(eval) + ReLU --------------------
    g = (g + vec_ref[B3]) * vec_ref[GS] + vec_ref[GB]
    gc = jnp.maximum(g, 0.0)

    # ---- layer_norm(mean over H,W, keepdim) * global_feat -------------------
    cmask = vec_ref[CM]                                         # (Cp, 1) real-channel mask
    gm = jnp.sum(gc * mask, axis=1, keepdims=True) * inv_hw     # (Cp, 1) interior mean
    mu = jnp.sum(gm * cmask) * inv_c                            # LN over [C,1,1]
    varc = jnp.sum(((gm - mu) * cmask) ** 2) * inv_c
    gmn = (gm - mu) * lax.rsqrt(varc + _EPS) * vec_ref[LNG] + vec_ref[LNB]
    global_feat = gmn * gc                                      # (Cp, NP)

    # ---- edge magnitude ------------------------------------------------------
    edge = jnp.tanh(inv * jnp.sqrt(ex * ex + ey * ey))

    # ---- edge_conv: Conv2d(2C, C, 1) + BN(eval) + ReLU (split halves) -------
    e = (jnp.dot(we1_ref[...], xn, preferred_element_type=jnp.float32) +
         jnp.dot(we2_ref[...], edge, preferred_element_type=jnp.float32))
    e = (e + vec_ref[BE]) * vec_ref[ES] + vec_ref[EB]
    edge_feat = jnp.maximum(e, 0.0)

    # ---- fusion_conv: Conv2d(2C, C, 1) + BN(eval); sigmoid attention --------
    f = (jnp.dot(wf1_ref[...], global_feat, preferred_element_type=jnp.float32) +
         jnp.dot(wf2_ref[...], edge_feat, preferred_element_type=jnp.float32))
    f = (f + vec_ref[BF]) * vec_ref[FS] + vec_ref[FB]
    attention = jax.nn.sigmoid(f)

    o_ref[0] = attention * (global_feat + edge_feat)


# ------------------------------ glue ----------------------------------------

def _fold_bn(gamma, beta, mean, var):
    scale = gamma / jnp.sqrt(var + _EPS)
    return scale, beta - mean * scale


def glfi_forward(x, params):
    B, C, H, W = x.shape
    Hp, Wp = H + 2, W + 2
    Np = Hp * Wp
    NP = ((Np + 127) // 128) * 128          # lane-padded flattened length
    Cp = ((max(C, 8) + 7) // 8) * 8         # sublane-padded channel count

    # Only the reflect-padded input is streamed; the zero-padded copy is
    # reconstructed in-kernel as xr * mask.
    xpr = jnp.pad(x, ((0, 0), (0, 0), (1, 1), (1, 1)), mode='reflect')
    xpr = jnp.pad(xpr, ((0, 0), (0, Cp - C), (0, 0), (0, 0)))
    xrf = jnp.pad(xpr.reshape(B, Cp, Np), ((0, 0), (0, 0), (0, NP - Np)))   # (B, Cp, NP)

    # Interior-pixel mask and its 9 tap-shifted variants (tiny, precomputed).
    mask2d = jnp.zeros((Hp, Wp), jnp.float32).at[1:H + 1, 1:W + 1].set(1.0)
    mask_flat = jnp.pad(mask2d.reshape(Np), (0, NP - Np))                    # (NP,)
    offs = [(t // 3 - 1) * Wp + (t % 3 - 1) for t in range(9)]
    mask9 = jnp.stack([jnp.roll(mask_flat, -off) for off in offs])           # (9, NP)
    mask9 = mask9.reshape(9, 1, NP)

    # 3x3 weight repacked tap-major: w3f[t, o, i] = w3[o, i, t//3, t%3].
    w3p = jnp.pad(params['w3'], ((0, Cp - C), (0, Cp - C), (0, 0), (0, 0)))
    w3f = jnp.transpose(w3p, (2, 3, 0, 1)).reshape(9, Cp, Cp)

    # 1x1 weights split into (Cp, Cp) halves (first input / second input).
    def pack_half(w, half):
        wp = jnp.zeros((Cp, Cp), jnp.float32)
        return wp.at[:C, :C].set(w[:, half * C:(half + 1) * C])

    we1, we2 = pack_half(params['we'], 0), pack_half(params['we'], 1)
    wf1, wf2 = pack_half(params['wf'], 0), pack_half(params['wf'], 1)

    gs, gb = _fold_bn(params['g_gamma'], params['g_beta'], params['g_mean'], params['g_var'])
    es, eb = _fold_bn(params['e_gamma'], params['e_beta'], params['e_mean'], params['e_var'])
    fs, fb = _fold_bn(params['f_gamma'], params['f_beta'], params['f_mean'], params['f_var'])

    padc = lambda v: jnp.pad(v, (0, Cp - C))
    cmask = padc(jnp.ones((C,), jnp.float32))
    vec = jnp.stack([padc(params['b3']), padc(gs), padc(gb),
                     padc(params['ln_g']), padc(params['ln_b']),
                     padc(params['be']), padc(es), padc(eb),
                     padc(params['bf']), padc(fs), padc(fb), cmask],
                    axis=0)[:, :, None]                                      # (12, Cp, 1)

    kernel = functools.partial(glfi_kernel, H=H, W=W, Wp=Wp, C=C)

    # Rough per-step VMEM footprint: 2x double-buffered (Cp,NP) blocks (in/out)
    # + grid-invariant params (double-buffered) + ~10 live f32 (Cp,NP) temps.
    S = Cp * NP * 4
    param_bytes = (9 * Cp * Cp + 4 * Cp * Cp + NUM_VEC * Cp + 9 * NP) * 4
    est = 4 * S + 2 * param_bytes + 10 * S
    vmem_limit = int(min(max(est, 32 * 1024 * 1024), 64 * 1024 * 1024))

    out_flat = pl.pallas_call(
        kernel,
        out_shape=jax.ShapeDtypeStruct((B, Cp, NP), jnp.float32),
        grid=(B,),
        in_specs=[
            pl.BlockSpec((1, Cp, NP), lambda b: (b, 0, 0)),       # xr (per batch)
            pl.BlockSpec((9, 1, NP), lambda b: (0, 0, 0)),        # shifted masks
            pl.BlockSpec((9, Cp, Cp), lambda b: (0, 0, 0)),       # 3x3 weights
            pl.BlockSpec((Cp, Cp), lambda b: (0, 0)),             # we1
            pl.BlockSpec((Cp, Cp), lambda b: (0, 0)),             # we2
            pl.BlockSpec((Cp, Cp), lambda b: (0, 0)),             # wf1
            pl.BlockSpec((Cp, Cp), lambda b: (0, 0)),             # wf2
            pl.BlockSpec((NUM_VEC, Cp, 1), lambda b: (0, 0, 0)),  # per-channel params
        ],
        out_specs=pl.BlockSpec((1, Cp, NP), lambda b: (b, 0, 0)),
        compiler_params=pltpu.CompilerParams(
            dimension_semantics=("parallel",),
            vmem_limit_bytes=vmem_limit),
    )(xrf, mask9, w3f, we1, we2, wf1, wf2, vec)

    out = out_flat[:, :C, :Np].reshape(B, C, Hp, Wp)[:, :, 1:H + 1, 1:W + 1]
    return out


# ------------------------- parameters & reference ----------------------------

def init_params(C, key):
    ks = jax.random.split(key, 20)

    def n(i, shape, scale=1.0):
        return scale * jax.random.normal(ks[i], shape, jnp.float32)

    return dict(
        w3=n(0, (C, C, 3, 3), 0.25), b3=n(1, (C,), 0.1),
        g_gamma=1.0 + n(2, (C,), 0.1), g_beta=n(3, (C,), 0.1),
        g_mean=n(4, (C,), 0.1),
        g_var=jax.random.uniform(ks[5], (C,), jnp.float32, 0.5, 1.5),
        ln_g=1.0 + n(6, (C,), 0.1), ln_b=n(7, (C,), 0.1),
        we=n(8, (C, 2 * C), 0.3), be=n(9, (C,), 0.1),
        e_gamma=1.0 + n(10, (C,), 0.1), e_beta=n(11, (C,), 0.1),
        e_mean=n(12, (C,), 0.1),
        e_var=jax.random.uniform(ks[13], (C,), jnp.float32, 0.5, 1.5),
        wf=n(14, (C, 2 * C), 0.3), bf=n(15, (C,), 0.1),
        f_gamma=1.0 + n(16, (C,), 0.1), f_beta=n(17, (C,), 0.1),
        f_mean=n(18, (C,), 0.1),
        f_var=jax.random.uniform(ks[19], (C,), jnp.float32, 0.5, 1.5),
    )


def glfi_reference(x, params):
    """Pure-JAX reference of the PyTorch forward (eval-mode BN)."""
    B, C, H, W = x.shape
    bc = lambda v: v[None, :, None, None]
    dn = ('NCHW', 'OIHW', 'NCHW')
    gs, gb = _fold_bn(params['g_gamma'], params['g_beta'], params['g_mean'], params['g_var'])
    es, eb = _fold_bn(params['e_gamma'], params['e_beta'], params['e_mean'], params['e_var'])
    fs, fb = _fold_bn(params['f_gamma'], params['f_beta'], params['f_mean'], params['f_var'])

    g = lax.conv_general_dilated(x, params['w3'], (1, 1), ((1, 1), (1, 1)),
                                 dimension_numbers=dn) + bc(params['b3'])
    g = jnp.maximum(g * bc(gs) + bc(gb), 0.0)
    gm = jnp.mean(g, axis=(2, 3), keepdims=True)
    mu = jnp.mean(gm, axis=(1, 2, 3), keepdims=True)
    var = jnp.mean((gm - mu) ** 2, axis=(1, 2, 3), keepdims=True)
    gmn = (gm - mu) / jnp.sqrt(var + _EPS) * bc(params['ln_g']) + bc(params['ln_b'])
    global_feat = gmn * g

    m = jnp.mean(x, axis=(2, 3), keepdims=True)
    v = jnp.mean((x - m) ** 2, axis=(2, 3), keepdims=True)
    xn = (x - m) / jnp.sqrt(v + _EPS)
    xp = jnp.pad(xn.reshape(B * C, 1, H, W), ((0, 0), (0, 0), (1, 1), (1, 1)), mode='reflect')
    sob_x = jnp.array([[-1., 0., 1.], [-2., 0., 2.], [-1., 0., 1.]], jnp.float32)[None, None]
    sob_y = jnp.array([[-1., -2., -1.], [0., 0., 0.], [1., 2., 1.]], jnp.float32)[None, None]
    ex = lax.conv_general_dilated(xp, sob_x, (1, 1), 'VALID', dimension_numbers=dn)
    ey = lax.conv_general_dilated(xp, sob_y, (1, 1), 'VALID', dimension_numbers=dn)
    edge = jnp.tanh(jnp.sqrt(ex ** 2 + ey ** 2)).reshape(B, C, H, W)

    e = jnp.einsum('oc,bchw->bohw', params['we'],
                   jnp.concatenate([xn, edge], axis=1)) + bc(params['be'])
    edge_feat = jnp.maximum(e * bc(es) + bc(eb), 0.0)

    f = jnp.einsum('oc,bchw->bohw', params['wf'],
                   jnp.concatenate([global_feat, edge_feat], axis=1)) + bc(params['bf'])
    attention = jax.nn.sigmoid(f * bc(fs) + bc(fb))
    return attention * (global_feat + edge_feat)


if __name__ == "__main__":
    B, C, H, W = 2, 4, 16, 16
    key = jax.random.PRNGKey(0)
    kx, kp = jax.random.split(key)
    x = jax.random.normal(kx, (B, C, H, W), jnp.float32)
    params = init_params(C, kp)

    out = glfi_forward(x, params)
    out = jax.block_until_ready(out)

    ref = glfi_reference(x, params)
    assert out.shape == (B, C, H, W)
    assert bool(jnp.isfinite(out).all())
    err = float(jnp.max(jnp.abs(out - ref)))
    assert err < 5e-4, f"mismatch vs reference: max abs err {err}"
    print("KERNEL_OK")
</pallas_src>

<mosaic_0001>
module attributes {stable_mosaic.version = 11 : i64} {
  func.func @glfi_kernel(%arg0: i32, %arg1: memref<1x8x384xf32, #tpu.memory_space<vmem>>, %arg2: memref<9x1x384xf32, #tpu.memory_space<vmem>>, %arg3: memref<9x8x8xf32, #tpu.memory_space<vmem>>, %arg4: memref<8x8xf32, #tpu.memory_space<vmem>>, %arg5: memref<8x8xf32, #tpu.memory_space<vmem>>, %arg6: memref<8x8xf32, #tpu.memory_space<vmem>>, %arg7: memref<8x8xf32, #tpu.memory_space<vmem>>, %arg8: memref<12x8x1xf32, #tpu.memory_space<vmem>>, %arg9: memref<1x8x384xf32, #tpu.memory_space<vmem>>) attributes {dimension_semantics = [#tpu.dimension_semantics<parallel>], iteration_bounds = array<i64: 2>, scalar_prefetch = 0 : i64, scratch_operands = 0 : i64, tpu.core_type = #tpu.core_type<tc>, window_params = [{transform_indices = @transform_0, window_bounds = array<i64: 1, 8, 384>}, {pipeline_mode = #tpu.pipeline_mode<synchronous>, transform_indices = @transform_1, window_bounds = array<i64: 9, 1, 384>}, {pipeline_mode = #tpu.pipeline_mode<synchronous>, transform_indices = @transform_2, window_bounds = array<i64: 9, 8, 8>}, {pipeline_mode = #tpu.pipeline_mode<synchronous>, transform_indices = @transform_3, window_bounds = array<i64: 8, 8>}, {pipeline_mode = #tpu.pipeline_mode<synchronous>, transform_indices = @transform_4, window_bounds = array<i64: 8, 8>}, {pipeline_mode = #tpu.pipeline_mode<synchronous>, transform_indices = @transform_5, window_bounds = array<i64: 8, 8>}, {pipeline_mode = #tpu.pipeline_mode<synchronous>, transform_indices = @transform_6, window_bounds = array<i64: 8, 8>}, {pipeline_mode = #tpu.pipeline_mode<synchronous>, transform_indices = @transform_7, window_bounds = array<i64: 12, 8, 1>}, {transform_indices = @transform_8, window_bounds = array<i64: 1, 8, 384>}]} {
    %c0 = arith.constant 0 : index
    %c0_0 = arith.constant 0 : index
    %c0_1 = arith.constant 0 : index
    %0 = vector.load %arg1[%c0, %c0_0, %c0_1] : memref<1x8x384xf32, #tpu.memory_space<vmem>>, vector<1x8x384xf32>
    %1 = vector.shape_cast %0 : vector<1x8x384xf32> to vector<8x384xf32>
    %c4 = arith.constant 4 : index
    %c0_2 = arith.constant 0 : index
    %c0_3 = arith.constant 0 : index
    %2 = vector.load %arg2[%c4, %c0_2, %c0_3] : memref<9x1x384xf32, #tpu.memory_space<vmem>>, vector<1x1x384xf32>
    %3 = vector.shape_cast %2 : vector<1x1x384xf32> to vector<1x384xf32>
    %4 = vector.broadcast %3 : vector<1x384xf32> to vector<8x384xf32>
    %5 = arith.mulf %1, %4 : vector<8x384xf32>
    %cst = arith.constant dense<0.000000e+00> : vector<8xf32>
    %6 = vector.multi_reduction <add>, %5, %cst [1] : vector<8x384xf32> to vector<8xf32>
    %7 = vector.shape_cast %6 : vector<8xf32> to vector<8x1xf32>
    %cst_4 = arith.constant 3.906250e-03 : f32
    %8 = vector.broadcast %cst_4 : f32 to vector<8x1xf32>
    %9 = arith.mulf %7, %8 : vector<8x1xf32>
    %10 = vector.broadcast %9 : vector<8x1xf32> to vector<8x384xf32>
    %11 = arith.subf %1, %10 : vector<8x384xf32>
    %12 = arith.mulf %11, %11 : vector<8x384xf32>
    %13 = vector.broadcast %3 : vector<1x384xf32> to vector<8x384xf32>
    %14 = arith.mulf %12, %13 : vector<8x384xf32>
    %cst_5 = arith.constant dense<0.000000e+00> : vector<8xf32>
    %15 = vector.multi_reduction <add>, %14, %cst_5 [1] : vector<8x384xf32> to vector<8xf32>
    %16 = vector.shape_cast %15 : vector<8xf32> to vector<8x1xf32>
    %cst_6 = arith.constant 3.906250e-03 : f32
    %17 = vector.broadcast %cst_6 : f32 to vector<8x1xf32>
    %18 = arith.mulf %16, %17 : vector<8x1xf32>
    %cst_7 = arith.constant 9.99999974E-6 : f32
    %19 = vector.broadcast %cst_7 : f32 to vector<8x1xf32>
    %20 = arith.addf %18, %19 : vector<8x1xf32>
    %21 = math.rsqrt %20 : vector<8x1xf32>
    %22 = vector.broadcast %21 : vector<8x1xf32> to vector<8x384xf32>
    %23 = arith.mulf %11, %22 : vector<8x384xf32>
    %c19_i32 = arith.constant 19 : i32
    %24 = tpu.dynamic_rotate %1 by %c19_i32 dim 1 : vector<8x384xf32>, i32 -> vector<8x384xf32>
    %c0_8 = arith.constant 0 : index
    %c0_9 = arith.constant 0 : index
    %c0_10 = arith.constant 0 : index
    %25 = vector.load %arg2[%c0_8, %c0_9, %c0_10] : memref<9x1x384xf32, #tpu.memory_space<vmem>>, vector<1x1x384xf32>
    %26 = vector.shape_cast %25 : vector<1x1x384xf32> to vector<1x384xf32>
    %27 = vector.broadcast %26 : vector<1x384xf32> to vector<8x384xf32>
    %28 = arith.mulf %24, %27 : vector<8x384xf32>
    %c0_11 = arith.constant 0 : index
    %c0_12 = arith.constant 0 : index
    %c0_13 = arith.constant 0 : index
    %29 = vector.load %arg3[%c0_11, %c0_12, %c0_13] : memref<9x8x8xf32, #tpu.memory_space<vmem>>, vector<1x8x8xf32>
    %30 = vector.shape_cast %29 : vector<1x8x8xf32> to vector<8x8xf32>
    %cst_14 = arith.constant dense<0.000000e+00> : vector<8x384xf32>
    %31 = tpu.matmul %30, %28, %cst_14 {dimension_numbers = #tpu.dot_dimension_numbers<[1], [0], [0], [1], [0, 0, 1, 1], [], []>} : vector<8x8xf32>, vector<8x384xf32>, vector<8x384xf32> -> vector<8x384xf32>
    %cst_15 = arith.constant -1.000000e+00 : f32
    %32 = vector.broadcast %cst_15 : f32 to vector<8x384xf32>
    %33 = arith.mulf %32, %24 : vector<8x384xf32>
    %cst_16 = arith.constant -1.000000e+00 : f32
    %34 = vector.broadcast %cst_16 : f32 to vector<8x384xf32>
    %35 = arith.mulf %34, %24 : vector<8x384xf32>
    %c18_i32 = arith.constant 18 : i32
    %36 = tpu.dynamic_rotate %1 by %c18_i32 dim 1 : vector<8x384xf32>, i32 -> vector<8x384xf32>
    %c1 = arith.constant 1 : index
    %c0_17 = arith.constant 0 : index
    %c0_18 = arith.constant 0 : index
    %37 = vector.load %arg2[%c1, %c0_17, %c0_18] : memref<9x1x384xf32, #tpu.memory_space<vmem>>, vector<1x1x384xf32>
    %38 = vector.shape_cast %37 : vector<1x1x384xf32> to vector<1x384xf32>
    %39 = vector.broadcast %38 : vector<1x384xf32> to vector<8x384xf32>
    %40 = arith.mulf %36, %39 : vector<8x384xf32>
    %c1_19 = arith.constant 1 : index
    %c0_20 = arith.constant 0 : index
    %c0_21 = arith.constant 0 : index
    %41 = vector.load %arg3[%c1_19, %c0_20, %c0_21] : memref<9x8x8xf32, #tpu.memory_space<vmem>>, vector<1x8x8xf32>
    %42 = vector.shape_cast %41 : vector<1x8x8xf32> to vector<8x8xf32>
    %cst_22 = arith.constant dense<0.000000e+00> : vector<8x384xf32>
    %43 = tpu.matmul %42, %40, %cst_22 {dimension_numbers = #tpu.dot_dimension_numbers<[1], [0], [0], [1], [0, 0, 1, 1], [], []>} : vector<8x8xf32>, vector<8x384xf32>, vector<8x384xf32> -> vector<8x384xf32>
    %44 = arith.addf %31, %43 : vector<8x384xf32>
    %cst_23 = arith.constant -2.000000e+00 : f32
    %45 = vector.broadcast %cst_23 : f32 to vector<8x384xf32>
    %46 = arith.mulf %45, %36 : vector<8x384xf32>
    %47 = arith.addf %35, %46 : vector<8x384xf32>
    %c17_i32 = arith.constant 17 : i32
    %48 = tpu.dynamic_rotate %1 by %c17_i32 dim 1 : vector<8x384xf32>, i32 -> vector<8x384xf32>
    %c2 = arith.constant 2 : index
    %c0_24 = arith.constant 0 : index
    %c0_25 = arith.constant 0 : index
    %49 = vector.load %arg2[%c2, %c0_24, %c0_25] : memref<9x1x384xf32, #tpu.memory_space<vmem>>, vector<1x1x384xf32>
    %50 = vector.shape_cast %49 : vector<1x1x384xf32> to vector<1x384xf32>
    %51 = vector.broadcast %50 : vector<1x384xf32> to vector<8x384xf32>
    %52 = arith.mulf %48, %51 : vector<8x384xf32>
    %c2_26 = arith.constant 2 : index
    %c0_27 = arith.constant 0 : index
    %c0_28 = arith.constant 0 : index
    %53 = vector.load %arg3[%c2_26, %c0_27, %c0_28] : memref<9x8x8xf32, #tpu.memory_space<vmem>>, vector<1x8x8xf32>
    %54 = vector.shape_cast %53 : vector<1x8x8xf32> to vector<8x8xf32>
    %cst_29 = arith.constant dense<0.000000e+00> : vector<8x384xf32>
    %55 = tpu.matmul %54, %52, %cst_29 {dimension_numbers = #tpu.dot_dimension_numbers<[1], [0], [0], [1], [0, 0, 1, 1], [], []>} : vector<8x8xf32>, vector<8x384xf32>, vector<8x384xf32> -> vector<8x384xf32>
    %56 = arith.addf %44, %55 : vector<8x384xf32>
    %cst_30 = arith.constant 1.000000e+00 : f32
    %57 = vector.broadcast %cst_30 : f32 to vector<8x384xf32>
    %58 = arith.mulf %57, %48 : vector<8x384xf32>
    %59 = arith.addf %33, %58 : vector<8x384xf32>
    %cst_31 = arith.constant -1.000000e+00 : f32
    %60 = vector.broadcast %cst_31 : f32 to vector<8x384xf32>
    %61 = arith.mulf %60, %48 : vector<8x384xf32>
    %62 = arith.addf %47, %61 : vector<8x384xf32>
    %c1_i32 = arith.constant 1 : i32
    %63 = tpu.dynamic_rotate %1 by %c1_i32 dim 1 : vector<8x384xf32>, i32 -> vector<8x384xf32>
    %c3 = arith.constant 3 : index
    %c0_32 = arith.constant 0 : index
    %c0_33 = arith.constant 0 : index
    %64 = vector.load %arg2[%c3, %c0_32, %c0_33] : memref<9x1x384xf32, #tpu.memory_space<vmem>>, vector<1x1x384xf32>
    %65 = vector.shape_cast %64 : vector<1x1x384xf32> to vector<1x384xf32>
    %66 = vector.broadcast %65 : vector<1x384xf32> to vector<8x384xf32>
    %67 = arith.mulf %63, %66 : vector<8x384xf32>
    %c3_34 = arith.constant 3 : index
    %c0_35 = arith.constant 0 : index
    %c0_36 = arith.constant 0 : index
    %68 = vector.load %arg3[%c3_34, %c0_35, %c0_36] : memref<9x8x8xf32, #tpu.memory_space<vmem>>, vector<1x8x8xf32>
    %69 = vector.shape_cast %68 : vector<1x8x8xf32> to vector<8x8xf32>
    %cst_37 = arith.constant dense<0.000000e+00> : vector<8x384xf32>
    %70 = tpu.matmul %69, %67, %cst_37 {dimension_numbers = #tpu.dot_dimension_numbers<[1], [0], [0], [1], [0, 0, 1, 1], [], []>} : vector<8x8xf32>, vector<8x384xf32>, vector<8x384xf32> -> vector<8x384xf32>
    %71 = arith.addf %56, %70 : vector<8x384xf32>
    %cst_38 = arith.constant -2.000000e+00 : f32
    %72 = vector.broadcast %cst_38 : f32 to vector<8x384xf32>
    %73 = arith.mulf %72, %63 : vector<8x384xf32>
    %74 = arith.addf %59, %73 : vector<8x384xf32>
    %c4_39 = arith.constant 4 : index
    %c0_40 = arith.constant 0 : index
    %c0_41 = arith.constant 0 : index
    %75 = vector.load %arg3[%c4_39, %c0_40, %c0_41] : memref<9x8x8xf32, #tpu.memory_space<vmem>>, vector<1x8x8xf32>
    %76 = vector.shape_cast %75 : vector<1x8x8xf32> to vector<8x8xf32>
    %cst_42 = arith.constant dense<0.000000e+00> : vector<8x384xf32>
    %77 = tpu.matmul %76, %5, %cst_42 {dimension_numbers = #tpu.dot_dimension_numbers<[1], [0], [0], [1], [0, 0, 1, 1], [], []>} : vector<8x8xf32>, vector<8x384xf32>, vector<8x384xf32> -> vector<8x384xf32>
    %78 = arith.addf %71, %77 : vector<8x384xf32>
    %c383_i32 = arith.constant 383 : i32
    %79 = tpu.dynamic_rotate %1 by %c383_i32 dim 1 : vector<8x384xf32>, i32 -> vector<8x384xf32>
    %c5 = arith.constant 5 : index
    %c0_43 = arith.constant 0 : index
    %c0_44 = arith.constant 0 : index
    %80 = vector.load %arg2[%c5, %c0_43, %c0_44] : memref<9x1x384xf32, #tpu.memory_space<vmem>>, vector<1x1x384xf32>
    %81 = vector.shape_cast %80 : vector<1x1x384xf32> to vector<1x384xf32>
    %82 = vector.broadcast %81 : vector<1x384xf32> to vector<8x384xf32>
    %83 = arith.mulf %79, %82 : vector<8x384xf32>
    %c5_45 = arith.constant 5 : index
    %c0_46 = arith.constant 0 : index
    %c0_47 = arith.constant 0 : index
    %84 = vector.load %arg3[%c5_45, %c0_46, %c0_47] : memref<9x8x8xf32, #tpu.memory_space<vmem>>, vector<1x8x8xf32>
    %85 = vector.shape_cast %84 : vector<1x8x8xf32> to vector<8x8xf32>
    %cst_48 = arith.constant dense<0.000000e+00> : vector<8x384xf32>
    %86 = tpu.matmul %85, %83, %cst_48 {dimension_numbers = #tpu.dot_dimension_numbers<[1], [0], [0], [1], [0, 0, 1, 1], [], []>} : vector<8x8xf32>, vector<8x384xf32>, vector<8x384xf32> -> vector<8x384xf32>
    %87 = arith.addf %78, %86 : vector<8x384xf32>
    %cst_49 = arith.constant 2.000000e+00 : f32
    %88 = vector.broadcast %cst_49 : f32 to vector<8x384xf32>
    %89 = arith.mulf %88, %79 : vector<8x384xf32>
    %90 = arith.addf %74, %89 : vector<8x384xf32>
    %c367_i32 = arith.constant 367 : i32
    %91 = tpu.dynamic_rotate %1 by %c367_i32 dim 1 : vector<8x384xf32>, i32 -> vector<8x384xf32>
    %c6 = arith.constant 6 : index
    %c0_50 = arith.constant 0 : index
    %c0_51 = arith.constant 0 : index
    %92 = vector.load %arg2[%c6, %c0_50, %c0_51] : memref<9x1x384xf32, #tpu.memory_space<vmem>>, vector<1x1x384xf32>
    %93 = vector.shape_cast %92 : vector<1x1x384xf32> to vector<1x384xf32>
    %94 = vector.broadcast %93 : vector<1x384xf32> to vector<8x384xf32>
    %95 = arith.mulf %91, %94 : vector<8x384xf32>
    %c6_52 = arith.constant 6 : index
    %c0_53 = arith.constant 0 : index
    %c0_54 = arith.constant 0 : index
    %96 = vector.load %arg3[%c6_52, %c0_53, %c0_54] : memref<9x8x8xf32, #tpu.memory_space<vmem>>, vector<1x8x8xf32>
    %97 = vector.shape_cast %96 : vector<1x8x8xf32> to vector<8x8xf32>
    %cst_55 = arith.constant dense<0.000000e+00> : vector<8x384xf32>
    %98 = tpu.matmul %97, %95, %cst_55 {dimension_numbers = #tpu.dot_dimension_numbers<[1], [0], [0], [1], [0, 0, 1, 1], [], []>} : vector<8x8xf32>, vector<8x384xf32>, vector<8x384xf32> -> vector<8x384xf32>
    %99 = arith.addf %87, %98 : vector<8x384xf32>
    %cst_56 = arith.constant -1.000000e+00 : f32
    %100 = vector.broadcast %cst_56 : f32 to vector<8x384xf32>
    %101 = arith.mulf %100, %91 : vector<8x384xf32>
    %102 = arith.addf %90, %101 : vector<8x384xf32>
    %cst_57 = arith.constant 1.000000e+00 : f32
    %103 = vector.broadcast %cst_57 : f32 to vector<8x384xf32>
    %104 = arith.mulf %103, %91 : vector<8x384xf32>
    %105 = arith.addf %62, %104 : vector<8x384xf32>
    %c366_i32 = arith.constant 366 : i32
    %106 = tpu.dynamic_rotate %1 by %c366_i32 dim 1 : vector<8x384xf32>, i32 -> vector<8x384xf32>
    %c7 = arith.constant 7 : index
    %c0_58 = arith.constant 0 : index
    %c0_59 = arith.constant 0 : index
    %107 = vector.load %arg2[%c7, %c0_58, %c0_59] : memref<9x1x384xf32, #tpu.memory_space<vmem>>, vector<1x1x384xf32>
    %108 = vector.shape_cast %107 : vector<1x1x384xf32> to vector<1x384xf32>
    %109 = vector.broadcast %108 : vector<1x384xf32> to vector<8x384xf32>
    %110 = arith.mulf %106, %109 : vector<8x384xf32>
    %c7_60 = arith.constant 7 : index
    %c0_61 = arith.constant 0 : index
    %c0_62 = arith.constant 0 : index
    %111 = vector.load %arg3[%c7_60, %c0_61, %c0_62] : memref<9x8x8xf32, #tpu.memory_space<vmem>>, vector<1x8x8xf32>
    %112 = vector.shape_cast %111 : vector<1x8x8xf32> to vector<8x8xf32>
    %cst_63 = arith.constant dense<0.000000e+00> : vector<8x384xf32>
    %113 = tpu.matmul %112, %110, %cst_63 {dimension_numbers = #tpu.dot_dimension_numbers<[1], [0], [0], [1], [0, 0, 1, 1], [], []>} : vector<8x8xf32>, vector<8x384xf32>, vector<8x384xf32> -> vector<8x384xf32>
    %114 = arith.addf %99, %113 : vector<8x384xf32>
    %cst_64 = arith.constant 2.000000e+00 : f32
    %115 = vector.broadcast %cst_64 : f32 to vector<8x384xf32>
    %116 = arith.mulf %115, %106 : vector<8x384xf32>
    %117 = arith.addf %105, %116 : vector<8x384xf32>
    %c365_i32 = arith.constant 365 : i32
    %118 = tpu.dynamic_rotate %1 by %c365_i32 dim 1 : vector<8x384xf32>, i32 -> vector<8x384xf32>
    %c8 = arith.constant 8 : index
    %c0_65 = arith.constant 0 : index
    %c0_66 = arith.constant 0 : index
    %119 = vector.load %arg2[%c8, %c0_65, %c0_66] : memref<9x1x384xf32, #tpu.memory_space<vmem>>, vector<1x1x384xf32>
    %120 = vector.shape_cast %119 : vector<1x1x384xf32> to vector<1x384xf32>
    %121 = vector.broadcast %120 : vector<1x384xf32> to vector<8x384xf32>
    %122 = arith.mulf %118, %121 : vector<8x384xf32>
    %c8_67 = arith.constant 8 : index
    %c0_68 = arith.constant 0 : index
    %c0_69 = arith.constant 0 : index
    %123 = vector.load %arg3[%c8_67, %c0_68, %c0_69] : memref<9x8x8xf32, #tpu.memory_space<vmem>>, vector<1x8x8xf32>
    %124 = vector.shape_cast %123 : vector<1x8x8xf32> to vector<8x8xf32>
    %cst_70 = arith.constant dense<0.000000e+00> : vector<8x384xf32>
    %125 = tpu.matmul %124, %122, %cst_70 {dimension_numbers = #tpu.dot_dimension_numbers<[1], [0], [0], [1], [0, 0, 1, 1], [], []>} : vector<8x8xf32>, vector<8x384xf32>, vector<8x384xf32> -> vector<8x384xf32>
    %126 = arith.addf %114, %125 : vector<8x384xf32>
    %cst_71 = arith.constant 1.000000e+00 : f32
    %127 = vector.broadcast %cst_71 : f32 to vector<8x384xf32>
    %128 = arith.mulf %127, %118 : vector<8x384xf32>
    %129 = arith.addf %102, %128 : vector<8x384xf32>
    %cst_72 = arith.constant 1.000000e+00 : f32
    %130 = vector.broadcast %cst_72 : f32 to vector<8x384xf32>
    %131 = arith.mulf %130, %118 : vector<8x384xf32>
    %132 = arith.addf %117, %131 : vector<8x384xf32>
    %c0_73 = arith.constant 0 : index
    %c0_74 = arith.constant 0 : index
    %c0_75 = arith.constant 0 : index
    %133 = vector.load %arg8[%c0_73, %c0_74, %c0_75] : memref<12x8x1xf32, #tpu.memory_space<vmem>>, vector<1x8x1xf32>
    %134 = vector.shape_cast %133 : vector<1x8x1xf32> to vector<8x1xf32>
    %135 = vector.broadcast %134 : vector<8x1xf32> to vector<8x384xf32>
    %136 = arith.addf %126, %135 : vector<8x384xf32>
    %c1_76 = arith.constant 1 : index
    %c0_77 = arith.constant 0 : index
    %c0_78 = arith.constant 0 : index
    %137 = vector.load %arg8[%c1_76, %c0_77, %c0_78] : memref<12x8x1xf32, #tpu.memory_space<vmem>>, vector<1x8x1xf32>
    %138 = vector.shape_cast %137 : vector<1x8x1xf32> to vector<8x1xf32>
    %139 = vector.broadcast %138 : vector<8x1xf32> to vector<8x384xf32>
    %140 = arith.mulf %136, %139 : vector<8x384xf32>
    %c2_79 = arith.constant 2 : index
    %c0_80 = arith.constant 0 : index
    %c0_81 = arith.constant 0 : index
    %141 = vector.load %arg8[%c2_79, %c0_80, %c0_81] : memref<12x8x1xf32, #tpu.memory_space<vmem>>, vector<1x8x1xf32>
    %142 = vector.shape_cast %141 : vector<1x8x1xf32> to vector<8x1xf32>
    %143 = vector.broadcast %142 : vector<8x1xf32> to vector<8x384xf32>
    %144 = arith.addf %140, %143 : vector<8x384xf32>
    %cst_82 = arith.constant 0.000000e+00 : f32
    %145 = vector.broadcast %cst_82 : f32 to vector<8x384xf32>
    %146 = arith.maximumf %144, %145 : vector<8x384xf32>
    %c11 = arith.constant 11 : index
    %c0_83 = arith.constant 0 : index
    %c0_84 = arith.constant 0 : index
    %147 = vector.load %arg8[%c11, %c0_83, %c0_84] : memref<12x8x1xf32, #tpu.memory_space<vmem>>, vector<1x8x1xf32>
    %148 = vector.shape_cast %147 : vector<1x8x1xf32> to vector<8x1xf32>
    %149 = vector.broadcast %3 : vector<1x384xf32> to vector<8x384xf32>
    %150 = arith.mulf %146, %149 : vector<8x384xf32>
    %cst_85 = arith.constant dense<0.000000e+00> : vector<8xf32>
    %151 = vector.multi_reduction <add>, %150, %cst_85 [1] : vector<8x384xf32> to vector<8xf32>
    %152 = vector.shape_cast %151 : vector<8xf32> to vector<8x1xf32>
    %cst_86 = arith.constant 3.906250e-03 : f32
    %153 = vector.broadcast %cst_86 : f32 to vector<8x1xf32>
    %154 = arith.mulf %152, %153 : vector<8x1xf32>
    %155 = arith.mulf %154, %148 : vector<8x1xf32>
    %156 = vector.shape_cast %155 : vector<8x1xf32> to vector<1x8x1xf32>
    %cst_87 = arith.constant dense<0.000000e+00> : vector<1xf32>
    %157 = vector.multi_reduction <add>, %156, %cst_87 [1, 2] : vector<1x8x1xf32> to vector<1xf32>
    %158 = vector.shape_cast %157 : vector<1xf32> to vector<1x1x1xf32>
    %159 = vector.extract %158[0, 0, 0] : f32 from vector<1x1x1xf32>
    %cst_88 = arith.constant 2.500000e-01 : f32
    %160 = arith.mulf %159, %cst_88 : f32
    %161 = vector.broadcast %160 : f32 to vector<8x1xf32>
    %162 = arith.subf %154, %161 : vector<8x1xf32>
    %163 = arith.mulf %162, %148 : vector<8x1xf32>
    %164 = arith.mulf %163, %163 : vector<8x1xf32>
    %165 = vector.shape_cast %164 : vector<8x1xf32> to vector<1x8x1xf32>
    %cst_89 = arith.constant dense<0.000000e+00> : vector<1xf32>
    %166 = vector.multi_reduction <add>, %165, %cst_89 [1, 2] : vector<1x8x1xf32> to vector<1xf32>
    %167 = vector.shape_cast %166 : vector<1xf32> to vector<1x1x1xf32>
    %168 = vector.extract %167[0, 0, 0] : f32 from vector<1x1x1xf32>
    %cst_90 = arith.constant 2.500000e-01 : f32
    %169 = arith.mulf %168, %cst_90 : f32
    %170 = vector.broadcast %160 : f32 to vector<8x1xf32>
    %171 = arith.subf %154, %170 : vector<8x1xf32>
    %cst_91 = arith.constant 9.99999974E-6 : f32
    %172 = arith.addf %169, %cst_91 : f32
    %173 = math.rsqrt %172 : f32
    %174 = vector.broadcast %173 : f32 to vector<8x1xf32>
    %175 = arith.mulf %171, %174 : vector<8x1xf32>
    %c3_92 = arith.constant 3 : index
    %c0_93 = arith.constant 0 : index
    %c0_94 = arith.constant 0 : index
    %176 = vector.load %arg8[%c3_92, %c0_93, %c0_94] : memref<12x8x1xf32, #tpu.memory_space<vmem>>, vector<1x8x1xf32>
    %177 = vector.shape_cast %176 : vector<1x8x1xf32> to vector<8x1xf32>
    %178 = arith.mulf %175, %177 : vector<8x1xf32>
    %c4_95 = arith.constant 4 : index
    %c0_96 = arith.constant 0 : index
    %c0_97 = arith.constant 0 : index
    %179 = vector.load %arg8[%c4_95, %c0_96, %c0_97] : memref<12x8x1xf32, #tpu.memory_space<vmem>>, vector<1x8x1xf32>
    %180 = vector.shape_cast %179 : vector<1x8x1xf32> to vector<8x1xf32>
    %181 = arith.addf %178, %180 : vector<8x1xf32>
    %182 = vector.broadcast %181 : vector<8x1xf32> to vector<8x384xf32>
    %183 = arith.mulf %182, %146 : vector<8x384xf32>
    %184 = arith.mulf %129, %129 : vector<8x384xf32>
    %185 = arith.mulf %132, %132 : vector<8x384xf32>
    %186 = arith.addf %184, %185 : vector<8x384xf32>
    %187 = math.sqrt %186 : vector<8x384xf32>
    %188 = vector.broadcast %21 : vector<8x1xf32> to vector<8x384xf32>
    %189 = arith.mulf %188, %187 : vector<8x384xf32>
    %190 = math.tanh %189 : vector<8x384xf32>
    %c0_98 = arith.constant 0 : index
    %c0_99 = arith.constant 0 : index
    %191 = vector.load %arg4[%c0_98, %c0_99] : memref<8x8xf32, #tpu.memory_space<vmem>>, vector<8x8xf32>
    %cst_100 = arith.constant dense<0.000000e+00> : vector<8x384xf32>
    %192 = tpu.matmul %191, %23, %cst_100 {dimension_numbers = #tpu.dot_dimension_numbers<[1], [0], [0], [1], [0, 0, 1, 1], [], []>} : vector<8x8xf32>, vector<8x384xf32>, vector<8x384xf32> -> vector<8x384xf32>
    %c0_101 = arith.constant 0 : index
    %c0_102 = arith.constant 0 : index
    %193 = vector.load %arg5[%c0_101, %c0_102] : memref<8x8xf32, #tpu.memory_space<vmem>>, vector<8x8xf32>
    %cst_103 = arith.constant dense<0.000000e+00> : vector<8x384xf32>
    %194 = tpu.matmul %193, %190, %cst_103 {dimension_numbers = #tpu.dot_dimension_numbers<[1], [0], [0], [1], [0, 0, 1, 1], [], []>} : vector<8x8xf32>, vector<8x384xf32>, vector<8x384xf32> -> vector<8x384xf32>
    %195 = arith.addf %192, %194 : vector<8x384xf32>
    %c5_104 = arith.constant 5 : index
    %c0_105 = arith.constant 0 : index
    %c0_106 = arith.constant 0 : index
    %196 = vector.load %arg8[%c5_104, %c0_105, %c0_106] : memref<12x8x1xf32, #tpu.memory_space<vmem>>, vector<1x8x1xf32>
    %197 = vector.shape_cast %196 : vector<1x8x1xf32> to vector<8x1xf32>
    %198 = vector.broadcast %197 : vector<8x1xf32> to vector<8x384xf32>
    %199 = arith.addf %195, %198 : vector<8x384xf32>
    %c6_107 = arith.constant 6 : index
    %c0_108 = arith.constant 0 : index
    %c0_109 = arith.constant 0 : index
    %200 = vector.load %arg8[%c6_107, %c0_108, %c0_109] : memref<12x8x1xf32, #tpu.memory_space<vmem>>, vector<1x8x1xf32>
    %201 = vector.shape_cast %200 : vector<1x8x1xf32> to vector<8x1xf32>
    %202 = vector.broadcast %201 : vector<8x1xf32> to vector<8x384xf32>
    %203 = arith.mulf %199, %202 : vector<8x384xf32>
    %c7_110 = arith.constant 7 : index
    %c0_111 = arith.constant 0 : index
    %c0_112 = arith.constant 0 : index
    %204 = vector.load %arg8[%c7_110, %c0_111, %c0_112] : memref<12x8x1xf32, #tpu.memory_space<vmem>>, vector<1x8x1xf32>
    %205 = vector.shape_cast %204 : vector<1x8x1xf32> to vector<8x1xf32>
    %206 = vector.broadcast %205 : vector<8x1xf32> to vector<8x384xf32>
    %207 = arith.addf %203, %206 : vector<8x384xf32>
    %cst_113 = arith.constant 0.000000e+00 : f32
    %208 = vector.broadcast %cst_113 : f32 to vector<8x384xf32>
    %209 = arith.maximumf %207, %208 : vector<8x384xf32>
    %c0_114 = arith.constant 0 : index
    %c0_115 = arith.constant 0 : index
    %210 = vector.load %arg6[%c0_114, %c0_115] : memref<8x8xf32, #tpu.memory_space<vmem>>, vector<8x8xf32>
    %cst_116 = arith.constant dense<0.000000e+00> : vector<8x384xf32>
    %211 = tpu.matmul %210, %183, %cst_116 {dimension_numbers = #tpu.dot_dimension_numbers<[1], [0], [0], [1], [0, 0, 1, 1], [], []>} : vector<8x8xf32>, vector<8x384xf32>, vector<8x384xf32> -> vector<8x384xf32>
    %c0_117 = arith.constant 0 : index
    %c0_118 = arith.constant 0 : index
    %212 = vector.load %arg7[%c0_117, %c0_118] : memref<8x8xf32, #tpu.memory_space<vmem>>, vector<8x8xf32>
    %cst_119 = arith.constant dense<0.000000e+00> : vector<8x384xf32>
    %213 = tpu.matmul %212, %209, %cst_119 {dimension_numbers = #tpu.dot_dimension_numbers<[1], [0], [0], [1], [0, 0, 1, 1], [], []>} : vector<8x8xf32>, vector<8x384xf32>, vector<8x384xf32> -> vector<8x384xf32>
    %214 = arith.addf %211, %213 : vector<8x384xf32>
    %c8_120 = arith.constant 8 : index
    %c0_121 = arith.constant 0 : index
    %c0_122 = arith.constant 0 : index
    %215 = vector.load %arg8[%c8_120, %c0_121, %c0_122] : memref<12x8x1xf32, #tpu.memory_space<vmem>>, vector<1x8x1xf32>
    %216 = vector.shape_cast %215 : vector<1x8x1xf32> to vector<8x1xf32>
    %217 = vector.broadcast %216 : vector<8x1xf32> to vector<8x384xf32>
    %218 = arith.addf %214, %217 : vector<8x384xf32>
    %c9 = arith.constant 9 : index
    %c0_123 = arith.constant 0 : index
    %c0_124 = arith.constant 0 : index
    %219 = vector.load %arg8[%c9, %c0_123, %c0_124] : memref<12x8x1xf32, #tpu.memory_space<vmem>>, vector<1x8x1xf32>
    %220 = vector.shape_cast %219 : vector<1x8x1xf32> to vector<8x1xf32>
    %221 = vector.broadcast %220 : vector<8x1xf32> to vector<8x384xf32>
    %222 = arith.mulf %218, %221 : vector<8x384xf32>
    %c10 = arith.constant 10 : index
    %c0_125 = arith.constant 0 : index
    %c0_126 = arith.constant 0 : index
    %223 = vector.load %arg8[%c10, %c0_125, %c0_126] : memref<12x8x1xf32, #tpu.memory_space<vmem>>, vector<1x8x1xf32>
    %224 = vector.shape_cast %223 : vector<1x8x1xf32> to vector<8x1xf32>
    %225 = vector.broadcast %224 : vector<8x1xf32> to vector<8x384xf32>
    %226 = arith.addf %222, %225 : vector<8x384xf32>
    %227 = arith.negf %226 : vector<8x384xf32>
    %228 = math.exp %227 : vector<8x384xf32>
    %cst_127 = arith.constant 1.000000e+00 : f32
    %229 = vector.broadcast %cst_127 : f32 to vector<8x384xf32>
    %230 = arith.addf %229, %228 : vector<8x384xf32>
    %231 = arith.divf %229, %230 : vector<8x384xf32>
    %232 = arith.addf %183, %209 : vector<8x384xf32>
    %233 = arith.mulf %231, %232 : vector<8x384xf32>
    %c0_128 = arith.constant 0 : index
    %c0_129 = arith.constant 0 : index
    %c0_130 = arith.constant 0 : index
    %234 = vector.load %arg9[%c0_128, %c0_129, %c0_130] : memref<1x8x384xf32, #tpu.memory_space<vmem>>, vector<1x8x384xf32>
    %235 = vector.shape_cast %234 : vector<1x8x384xf32> to vector<8x384xf32>
    %236 = vector.shape_cast %233 : vector<8x384xf32> to vector<1x8x384xf32>
    tpu.vector_store %arg9[%c0_128, %c0_129, %c0_130], %236 {strides = array<i32>} : memref<1x8x384xf32, #tpu.memory_space<vmem>>, vector<1x8x384xf32>,
    return
  }
  func.func @transform_0(%arg0: i32) -> (i32, i32, i32) {
    %c0_i32 = arith.constant 0 : i32
    %c0_i32_0 = arith.constant 0 : i32
    %c0_i32_1 = arith.constant 0 : i32
    return %arg0, %c0_i32, %c0_i32_0 : i32, i32, i32
  }
  func.func @transform_1(%arg0: i32) -> (i32, i32, i32) {
    %c0_i32 = arith.constant 0 : i32
    %c0_i32_0 = arith.constant 0 : i32
    %c0_i32_1 = arith.constant 0 : i32
    %c0_i32_2 = arith.constant 0 : i32
    return %c0_i32, %c0_i32_0, %c0_i32_1 : i32, i32, i32
  }
  func.func @transform_2(%arg0: i32) -> (i32, i32, i32) {
    %c0_i32 = arith.constant 0 : i32
    %c0_i32_0 = arith.constant 0 : i32
    %c0_i32_1 = arith.constant 0 : i32
    %c0_i32_2 = arith.constant 0 : i32
    return %c0_i32, %c0_i32_0, %c0_i32_1 : i32, i32, i32
  }
  func.func @transform_3(%arg0: i32) -> (i32, i32) {
    %c0_i32 = arith.constant 0 : i32
    %c0_i32_0 = arith.constant 0 : i32
    %c0_i32_1 = arith.constant 0 : i32
    return %c0_i32, %c0_i32_0 : i32, i32
  }
  func.func @transform_4(%arg0: i32) -> (i32, i32) {
    %c0_i32 = arith.constant 0 : i32
    %c0_i32_0 = arith.constant 0 : i32
    %c0_i32_1 = arith.constant 0 : i32
    return %c0_i32, %c0_i32_0 : i32, i32
  }
  func.func @transform_5(%arg0: i32) -> (i32, i32) {
    %c0_i32 = arith.constant 0 : i32
    %c0_i32_0 = arith.constant 0 : i32
    %c0_i32_1 = arith.constant 0 : i32
    return %c0_i32, %c0_i32_0 : i32, i32
  }
  func.func @transform_6(%arg0: i32) -> (i32, i32) {
    %c0_i32 = arith.constant 0 : i32
    %c0_i32_0 = arith.constant 0 : i32
    %c0_i32_1 = arith.constant 0 : i32
    return %c0_i32, %c0_i32_0 : i32, i32
  }
  func.func @transform_7(%arg0: i32) -> (i32, i32, i32) {
    %c0_i32 = arith.constant 0 : i32
    %c0_i32_0 = arith.constant 0 : i32
    %c0_i32_1 = arith.constant 0 : i32
    %c0_i32_2 = arith.constant 0 : i32
    return %c0_i32, %c0_i32_0, %c0_i32_1 : i32, i32, i32
  }
  func.func @transform_8(%arg0: i32) -> (i32, i32, i32) {
    %c0_i32 = arith.constant 0 : i32
    %c0_i32_0 = arith.constant 0 : i32
    %c0_i32_1 = arith.constant 0 : i32
    return %arg0, %c0_i32, %c0_i32_0 : i32, i32, i32
  }
}

</mosaic_0001>

<bundles_post_ra>
// kernel: tpu_custom_call.1
= control target key start
LH: loop header
LB: loop body
LE: loop exit
PB: predicated region body
PF: predicated region fallthrough
CT: control target
= control target key end

     0   :  { %13 = vsyncpa [#allocation3], 0  ;;  %s3749_s0 = inlined_call_operand.vmem [shape: f32[2,8,384], index: 0, kind: input, shape index: {}]   ;;  %s3750_s1 = inlined_call_operand.vmem [shape: f32[9,1,384], index: 1, kind: input, shape index: {}]   ;;  %s3751_s2 = inlined_call_operand.vmem [shape: f32[9,8,8], index: 2, kind: input, shape index: {}]   ;;  %s3752_s3 = inlined_call_operand.vmem [shape: f32[8,8], index: 3, kind: input, shape index: {}]   ;;  %s3753_s4 = inlined_call_operand.vmem [shape: f32[8,8], index: 4, kind: input, shape index: {}]   ;;  %s3754_s5 = inlined_call_operand.vmem [shape: f32[8,8], index: 5, kind: input, shape index: {}]   ;;  %s3755_s6 = inlined_call_operand.vmem [shape: f32[8,8], index: 6, kind: input, shape index: {}]   ;;  %s3756_s7 = inlined_call_operand.vmem [shape: f32[12,8,1], index: 7, kind: input, shape index: {}]   ;;  %s3757_s8 = inlined_call_operand.hbm [shape: f32[2,8,384], index: 8, kind: output, shape index: {}]  }
   0x1   :  { %15 = vsyncpa [#allocation3 + $0x1], 0  ;;  %s3220_s27 = smov 0   ;;  %s3222_s28 = smov 0  }
   0x2   :  { %s3224_s29 = smov 0   ;;  %s3226_s30 = smov 0  }
   0x3 LB: > { %s3241_s9 = sadd.s32 4294967295, %s3161_s30   ;;  %s2857_s10 = sadd.s32 4294967294, %s3161_s30   ;;  %s3161_s30 = sphi %s3226_s30, %s3763_s30   ;;  %s3157_s29 = sphi %s3224_s29, %s3762_s29   ;;  %s3153_s28 = sphi %s3222_s28, %s3761_s28   ;;  %s3149_s27 = sphi %s3220_s27, %s3760_s27  }
   0x4   : > { %s3245_s11 = sadd.s32 1, %s3161_s30   ;;  %s201_s12 = sadd.s32 1, %s3157_s29 }
   0x5   : > { %s198_s13 = ssub.s32 %s3161_s30, %s3245_s11  ;;  %p211_p0 = scmp.ne.s32.totalorder %s3157_s29, %s3153_s28 }
   0x6   : > { %p199_p1 = scmp.eq.s32.totalorder %s198_s13, 0  ;;  %p212_p2 = scmp.eq.s32.totalorder %s3241_s9, 1 }
   0x7   : > { %p217_p3 = scmp.ne.s32.totalorder %s3153_s28, %s3149_s27  ;;  %p218_p4 = scmp.eq.s32.totalorder %s2857_s10, 1 }
   0x8   : > { %s3256_s14 = scalar_select %p199_p1, %s3157_s29, %s201_s12  }
   0x9   : > { %p3258_p5 = por %p212_p2, %p211_p0  ;;  %p3262_p6 = por %p218_p4, %p217_p3 }
   0xa   : > { %p2860_p7 = scmp.ge.s32.totalorder %s3161_s30, 1  ;;  %p265_p8 = scmp.lt.s32.totalorder %s3161_s30, 3 }
   0xc   : > { %p266_p9 = pnand %p2860_p7, %p265_p8 }
   0xd   : > { %p299_p10 = scmp.lt.s32.totalorder (!%p266_p9), %s3241_s9, 1  ;;  %s3165_s22 = smov (!%p266_p9), 18  }
   0xe   : > { %269 = sbr.rel (%p266_p9) target bundleno = 1409 (0x581), region = 52  ;;  %s3166_s23 = smov (!%p266_p9), 19  }
   0xf   : > { %s3167_s24 = smov (!%p266_p9), 17   ;;  %s3168_s25 = smov (!%p266_p9), 1  }
  0x10   : > { %s3169_s26 = smov (!%p266_p9), 127   ;;  %s3170_s10 = smov (!%p266_p9), 111  }
  0x11   : > { %s3171_s12 = smov (!%p266_p9), 110   ;;  %s3172_s13 = smov (!%p266_p9), 109  }
  0x13   : > { %v3163_v0 = vmov 0.0   ;;  %s300_s17 = scalar_select %p299_p10, %s3241_s9, 1  ;;  %vm3164_vm0 = vmmov 0   ;;  %v2896_v4 = vld [vmem:[%s3756_s7 + $0x8] sm:$0xff]  ;;  %v1987_v5 = vld [vmem:[%s3756_s7] sm:$0xff]  ;;  %v3173_v6 = vmov 0   ;;  %v310_v8 = vlaneseq }
  0x14   : > { %2947 = vmatprep.subr.mxu1 %v3163_v0  ;;  %489 = vmatprep.mubr.f32.mxu0 %v3163_v0  ;;  %v2897_v7 = vld [vmem:[%s3756_s7 + $0x10] sm:$0xff]  ;;  %v2863_v16 = vld [vmem:[%s3750_s1 + $0x3] sm:$0x7]  ;;  %v364_v17 = vld [vmem:[%s3750_s1] sm:$0x7]  ;;  %vm421_vm3 = vcmask 64512  }
  0x15   : > { %s3013_s18 = smul.u32 24, %s300_s17  ;;  %2949 = vmatprep.mubr.msk.f32.mxu1 %vm3164_vm0, %v3163_v0  ;;  %3072 = vset.pattern.permute.xlu1 %v3173_v6  ;;  %v311_v9 = vshrl.u32 %v310_v8, 7  ;;  %v3316_v10 = vand.u32 127, %v310_v8  ;;  %v3339_v27 = vld [vmem:[%s3750_s1 + $0x6] sm:$0x7]  ;;  %vm2030_vm10 = vcmask 7168  }
  0x16   : > { %3071 = vset.pattern.permute.xlu0 %v3173_v6  ;;  %v2864_v33 = vld [vmem:[%s3751_s2 + $0x8] sm:$0xff]  ;;  %v384_v49 = vld [vmem:[%s3751_s2] sm:$0xff] }
  0x17   : > { %s303_s21 = scalar_lea.vmem %s3749_s0, %s3013_s18  ;;  %v3318_v11 = vsub.s32 1, %v311_v9  ;;  %v3320_v12 = vsub.s32 2, %v311_v9  ;;  %v3322_v13 = vsub.s32 0, %v311_v9  ;;  %vm394_vm1 = vcmp.lt.s32.totalorder %v3316_v10, 18  ;;  %v2873_v57 = vld [vmem:[%s3750_s1 + $0x9] sm:$0x7] }
  0x18   : > { %v3277_v1 = vld [vmem:[%s303_s21 + $0x10] sm:$0xff]  ;;  %v3279_v2 = vld [vmem:[%s303_s21] sm:$0xff]  ;;  %v3283_v3 = vld [vmem:[%s303_s21 + $0x8] sm:$0xff]  ;;  %vm360_vm2 = vcmp.lt.s32.totalorder %v3316_v10, 19  ;;  %vm722_vm4 = vcmp.lt.s32.totalorder %v3316_v10, 17  ;;  %vm911_vm5 = vcmp.lt.s32.totalorder %v3316_v10, 1 }
  0x19   : > { %392 = vrot.lane.b32.xlu1 %v3277_v1, %s3165_s22  ;;  %388 = vrot.lane.b32.xlu0 %v3279_v2, %s3165_s22  ;;  %v408_v18 = vrot.slane %v2863_v16, %v3318_v11  ;;  %v412_v19 = vrot.slane %v2863_v16, %v3320_v12  ;;  %v404_v20 = vrot.slane %v2863_v16, %v3322_v13  ;;  %v2862_v58 = vld [vmem:[%s3750_s1 + $0xc] sm:$0x7]  ;;  %v3389_v6 = vld [vmem:[%s3750_s1 + $0xf] sm:$0x7]  ;;  %vm1246_vm6 = vcmp.lt.s32.totalorder %v3316_v10, 127 }
  0x1a   : > { %v369_v25 = vrot.slane %v364_v17, %v3322_v13  ;;  %v373_v30 = vrot.slane %v364_v17, %v3318_v11  ;;  %v377_v31 = vrot.slane %v364_v17, %v3320_v12  ;;  %v736_v36 = vrot.slane %v3339_v27, %v3318_v11 }
  0x1b   : > { %v732_v53 = vrot.slane %v3339_v27, %v3322_v13  ;;  %v740_v62 = vrot.slane %v3339_v27, %v3320_v12  ;;  %v3395_v8 = vrot.slane %v2862_v58, %v3322_v13  ;;  %v925_v16 = vrot.slane %v2873_v57, %v3318_v11 }
  0x1c   : > { %v929_v17 = vrot.slane %v2873_v57, %v3320_v12  ;;  %vm1432_vm7 = vcmp.lt.s32.totalorder %v3316_v10, 111  ;;  %vm1621_vm8 = vcmp.lt.s32.totalorder %v3316_v10, 110  ;;  %vm1807_vm9 = vcmp.lt.s32.totalorder %v3316_v10, 109 }
  0x1d   : > { %352 = vrot.lane.b32.xlu1 %v3279_v2, %s3166_s23  ;;  %390 = vrot.lane.b32.xlu0 %v3283_v3, %s3165_s22  ;;  %s3174_s22 = smov [#allocation2]  }
  0x21   : > { %356 = vrot.lane.b32.xlu1 %v3277_v1, %s3166_s23  ;;  %354 = vrot.lane.b32.xlu0 %v3283_v3, %s3166_s23  ;;  %s3105_s23 = sshll.u32 %s3174_s22, 4  ;;  %s3106_s23 = int_to_ptr.vmem [resolvable:$false] %s3105_s23 }
  0x25   : > { %718 = vrot.lane.b32.xlu1 %v3283_v3, %s3167_s24  ;;  %716 = vrot.lane.b32.xlu0 %v3279_v2, %s3167_s24 }
  0x29   : > { %905 = vrot.lane.b32.xlu1 %v3279_v2, %s3168_s25  ;;  %720 = vrot.lane.b32.xlu0 %v3277_v1, %s3167_s24  ;;  %s3107_s24 = scalar_lea.vmem %s3106_s23, 768 }
  0x2d   : > { %909 = vrot.lane.b32.xlu1 %v3277_v1, %s3168_s25  ;;  %907 = vrot.lane.b32.xlu0 %v3283_v3, %s3168_s25 }
  0x31   : > { %1244 = vrot.lane.b32.xlu1 %v3277_v1, %s3169_s26  ;;  %1242 = vrot.lane.b32.xlu0 %v3283_v3, %s3169_s26 }
  0x35   : > { %1428 = vrot.lane.b32.xlu1 %v3283_v3, %s3170_s10  ;;  %1240 = vrot.lane.b32.xlu0 %v3279_v2, %s3169_s26  ;;  %s296_s26 = sand.u32 1, %s3153_s28  }
  0x39   : > { %1426 = vrot.lane.b32.xlu1 %v3279_v2, %s3170_s10  ;;  %1430 = vrot.lane.b32.xlu0 %v3277_v1, %s3170_s10 }
  0x3d   : > { %1619 = vrot.lane.b32.xlu1 %v3277_v1, %s3171_s12  ;;  %1617 = vrot.lane.b32.xlu0 %v3283_v3, %s3171_s12 }
  0x41   : > { %1803 = vrot.lane.b32.xlu1 %v3283_v3, %s3172_s13  ;;  %1615 = vrot.lane.b32.xlu0 %v3279_v2, %s3171_s12 }
  0x45   : > { %1801 = vrot.lane.b32.xlu1 %v3279_v2, %s3172_s13  ;;  %1805 = vrot.lane.b32.xlu0 %v3277_v1, %s3172_s13 }
  0x49   : > { %2000 = vperm.xlu1 %3072, %v2896_v4   ;;  %1990 = vperm.xlu0 %3071, %v1987_v5   ;;  %v921_v5 = vrot.slane %v2873_v57, %v3322_v13 }
  0x4d   : > { %2010 = vperm.xlu1 %3072, %v2897_v7   ;;  %v3392_v7 = vrot.slane %v2862_v58, %v3318_v11 }
  0x8b   : > { %v393_v14 = vpop.permute.xlu1 %392  ;;  %v389_v15 = vpop.permute.xlu0 %388 }
  0x8c   : > { %v397_v21 = vsel %vm394_vm1, %v393_v14, %v389_v15 }
  0x8d   : > { %v416_v32 = vmul.f32 %v404_v20, %v397_v21  ;;  %v710_v37 = vmul.f32 -2.0, %v397_v21 }
  0x8f   : > { %v353_v22 = vpop.permute.xlu1 %352  ;;  %v391_v23 = vpop.permute.xlu0 %390 }
  0x90   : > { %v395_v24 = vsel %vm394_vm1, %v391_v23, %v393_v14  ;;  %v396_v26 = vsel %vm394_vm1, %v389_v15, %v391_v23 }
  0x91   : > { %v417_v28 = vmul.f32 %v408_v18, %v396_v26  ;;  %v418_v29 = vmul.f32 %v412_v19, %v395_v24  ;;  %v712_v45 = vmul.f32 -2.0, %v395_v24  ;;  %v711_v46 = vmul.f32 -2.0, %v396_v26 }
  0x93   : > { %v357_v34 = vpop.permute.xlu1 %356  ;;  %455 = vmatprep.subr.mxu0 %v417_v28  ;;  %2948 = vmatpush3.msra.mxu1 %v418_v29  ;;  %v355_v35 = vpop.permute.xlu0 %354  ;;  %v3412_v28 = vmul.f32 %v3392_v7, %v3283_v3  ;;  %v3416_v29 = vmul.f32 %v3395_v8, %v3279_v2 }
  0x94   : > { %v363_v38 = vsel %vm360_vm2, %v357_v34, %v353_v22  ;;  %v361_v39 = vsel %vm360_vm2, %v355_v35, %v357_v34  ;;  %v362_v40 = vsel %vm360_vm2, %v353_v22, %v355_v35  ;;  %456 = vmatpush1.msra.mxu0 %v416_v32  ;;  %2952 = vmatprep.subr.mxu1 %v3163_v0  ;;  %v2870_v22 = vld [vmem:[%s3751_s2 + $0x10] sm:$0xff] }
  0x95   : > { %v381_v41 = vmul.f32 %v369_v25, %v363_v38  ;;  %v385_v42 = vmul.f32 -1.0, %v363_v38  ;;  %v382_v43 = vmul.f32 %v373_v30, %v362_v40  ;;  %v383_v44 = vmul.f32 %v377_v31, %v361_v39  ;;  %2865 = vmatmul.mubr.msk.f32.vlgmr.msra.gmra.mxu0 %vm421_vm3, %v2864_v33  ;;  %2950 = vmatmul.mubr.msk.f32.vlgmr.msra.gmra.mxu1 %vm421_vm3, %v2864_v33  ;;  %v2874_v38 = vld [vmem:[%s3751_s2 + $0x18] sm:$0xff] }
  0x96   : > { %v386_v47 = vmul.f32 -1.0, %v362_v40  ;;  %v387_v48 = vmul.f32 -1.0, %v361_v39  ;;  %633 = vmatprep.mubr.f32.mxu0 %v3163_v0  ;;  %2954 = vmatprep.mubr.msk.f32.mxu1 %vm3164_vm0, %v3163_v0  ;;  %v1260_v25 = vrot.slane %v3389_v6, %v3318_v11  ;;  %v3419_v30 = vrot.slane %v2862_v58, %v3320_v12 }
  0x97   : > { %v3364_v50 = vadd.f32 %v710_v37, %v385_v42  ;;  %v719_v51 = vpop.permute.xlu1 %718  ;;  %599 = vmatprep.subr.mxu0 %v382_v43  ;;  %2953 = vmatpush3.msra.mxu1 %v383_v44  ;;  %v717_v52 = vpop.permute.xlu0 %716 }
  0x98   : > { %v714_v54 = vadd.f32 %v711_v46, %v386_v47  ;;  %v715_v55 = vadd.f32 %v712_v45, %v387_v48  ;;  %v724_v56 = vsel %vm722_vm4, %v717_v52, %v719_v51  ;;  %600 = vmatpush1.msra.mxu0 %v381_v41  ;;  %2957 = vmatprep.subr.mxu1 %v3163_v0 }
  0x99   : > { %v897_v59 = vadd.f32 %v724_v56, %v386_v47  ;;  %v900_v60 = vmul.f32 -1.0, %v724_v56  ;;  %2867 = vmatmul.mubr.msk.f32.vlgmr.msra.gmra.mxu0 %vm421_vm3, %v384_v49  ;;  %v745_v61 = vmul.f32 %v736_v36, %v724_v56  ;;  %2955 = vmatmul.mubr.msk.f32.vlgmr.msra.gmra.mxu1 %vm421_vm3, %v384_v49  ;;  %v3442_v46 = vmul.f32 %v3419_v30, %v3277_v1 }
  0x9a   : > { %816 = vmatprep.mubr.f32.mxu0 %v3163_v0  ;;  %2959 = vmatprep.mubr.msk.f32.mxu1 %vm3164_vm0, %v3163_v0 }
  0x9b   : > { %v906_v63 = vpop.permute.xlu1 %905  ;;  %782 = vmatprep.subr.mxu0 %v745_v61  ;;  %v721_v4 = vpop.permute.xlu0 %720  ;;  %v3397_v9 = vadd.f32 %v900_v60, %v714_v54  ;;  %v1264_v54 = vrot.slane %v3389_v6, %v3320_v12 }
  0x9c   : > { %v723_v14 = vsel %vm722_vm4, %v719_v51, %v721_v4  ;;  %v725_v15 = vsel %vm722_vm4, %v721_v4, %v717_v52 }
  0x9d   : > { %v744_v18 = vmul.f32 %v732_v53, %v725_v15  ;;  %v746_v19 = vmul.f32 %v740_v62, %v723_v14  ;;  %v896_v20 = vadd.f32 %v725_v15, %v385_v42  ;;  %v898_v21 = vadd.f32 %v723_v14, %v387_v48 }
  0x9e   : > { %v899_v23 = vmul.f32 -1.0, %v725_v15  ;;  %v901_v24 = vmul.f32 -1.0, %v723_v14  ;;  %v1256_v53 = vrot.slane %v3389_v6, %v3322_v13  ;;  %v2881_v15 = vld [vmem:[%s3751_s2 + $0x28] sm:$0xff] }
  0x9f   : > { %v910_v26 = vpop.permute.xlu1 %909  ;;  %783 = vmatpush1.msra.mxu0 %v744_v18  ;;  %2958 = vmatpush3.msra.mxu1 %v746_v19  ;;  %v908_v27 = vpop.permute.xlu0 %907 }
  0xa0   : > { %v914_v31 = vsel %vm911_vm5, %v910_v26, %v906_v63  ;;  %v912_v32 = vsel %vm911_vm5, %v908_v27, %v910_v26  ;;  %v913_v33 = vsel %vm911_vm5, %v906_v63, %v908_v27  ;;  %2871 = vmatmul.mubr.msk.f32.vlgmr.msra.gmra.mxu0 %vm421_vm3, %v2870_v22  ;;  %2960 = vmatmul.mubr.msk.f32.vlgmr.msra.gmra.mxu1 %vm421_vm3, %v2870_v22  ;;  %v3479_v63 = vld [vmem:[%s3750_s1 + $0x15] sm:$0x7] }
  0xa1   : > { %v933_v34 = vmul.f32 %v921_v5, %v914_v31  ;;  %v1085_v35 = vmul.f32 -2.0, %v914_v31  ;;  %v934_v36 = vmul.f32 %v925_v16, %v913_v33  ;;  %v935_v37 = vmul.f32 %v929_v17, %v912_v32  ;;  %2962 = vmatprep.subr.mxu1 %v3163_v0  ;;  %2964 = vmatprep.mubr.msk.f32.mxu1 %vm3164_vm0, %v3163_v0 }
  0xa2   : > { %v1086_v39 = vmul.f32 -2.0, %v913_v33  ;;  %v1087_v40 = vmul.f32 -2.0, %v912_v32  ;;  %1005 = vmatprep.mubr.f32.mxu0 %v3163_v0  ;;  %v902_v41 = vadd.f32 %v899_v23, %v3364_v50  ;;  %v3438_v42 = vadd.f32 %v901_v24, %v715_v55  ;;  %v3450_v50 = vld [vmem:[%s3750_s1 + $0x12] sm:$0x7]  ;;  %v2877_v55 = vld [vmem:[%s3751_s2 + $0x20] sm:$0xff] }
  0xa3   : > { %v1088_v43 = vadd.f32 %v1085_v35, %v896_v20  ;;  %v1245_v44 = vpop.permute.xlu1 %1244  ;;  %971 = vmatprep.subr.mxu0 %v934_v36  ;;  %2963 = vmatpush3.msra.mxu1 %v935_v37  ;;  %v1243_v45 = vpop.permute.xlu0 %1242  ;;  %v1450_v62 = vrot.slane %v3450_v50, %v3320_v12  ;;  %v1446_v16 = vrot.slane %v3450_v50, %v3318_v11  ;;  %v2885_v36 = vld [vmem:[%s3751_s2 + $0x30] sm:$0xff] }
  0xa4   : > { %v1089_v47 = vadd.f32 %v1086_v39, %v897_v59  ;;  %v1090_v48 = vadd.f32 %v1087_v40, %v898_v21  ;;  %v1247_v49 = vsel %vm1246_vm6, %v1243_v45, %v1245_v44  ;;  %972 = vmatpush1.msra.mxu0 %v933_v34  ;;  %2965 = vmatmul.mubr.msk.f32.vlgmr.msra.gmra.mxu1 %vm421_vm3, %v2874_v38 }
  0xa5   : > { %v1269_v51 = vmul.f32 %v1260_v25, %v1247_v49  ;;  %v1421_v52 = vmul.f32 2.0, %v1247_v49  ;;  %2875 = vmatmul.mubr.msk.f32.vlgmr.msra.gmra.mxu0 %vm421_vm3, %v2874_v38  ;;  %1126 = vmatprep.subr.mxu0 %v3412_v28  ;;  %v1442_v59 = vrot.slane %v3450_v50, %v3322_v13  ;;  %v1635_v21 = vrot.slane %v3479_v63, %v3318_v11 }
  0xa6   : > { %1127 = vmatpush1.msra.mxu0 %v3416_v29  ;;  %2967 = vmatprep.subr.mxu1 %v3163_v0 }
  0xa7   : > { %v1424_v56 = vadd.f32 %v1421_v52, %v1089_v47  ;;  %v1429_v57 = vpop.permute.xlu1 %1428  ;;  %2968 = vmatpush3.msra.mxu1 %v3442_v46  ;;  %2969 = vmatprep.mubr.msk.f32.mxu1 %vm3164_vm0, %v3163_v0  ;;  %v1241_v58 = vpop.permute.xlu0 %1240  ;;  %v1639_v47 = vrot.slane %v3479_v63, %v3320_v12 }
  0xa8   : > { %v1248_v60 = vsel %vm1246_vm6, %v1241_v58, %v1243_v45  ;;  %v1249_v61 = vsel %vm1246_vm6, %v1245_v44, %v1241_v58  ;;  %1306 = vmatprep.subr.mxu0 %v1269_v51  ;;  %1160 = vmatprep.mubr.f32.mxu0 %v3163_v0  ;;  %v1631_v45 = vrot.slane %v3479_v63, %v3322_v13 }
  0xa9   : > { %v1268_v4 = vmul.f32 %v1256_v53, %v1248_v60  ;;  %v1270_v5 = vmul.f32 %v1264_v54, %v1249_v61  ;;  %v1420_v6 = vmul.f32 2.0, %v1248_v60  ;;  %v1422_v14 = vmul.f32 2.0, %v1249_v61  ;;  %2970 = vmatmul.mubr.msk.f32.vlgmr.msra.gmra.mxu1 %vm421_vm3, %v2877_v55  ;;  %2878 = vmatmul.mubr.msk.f32.vlgmr.msra.gmra.mxu0 %vm421_vm3, %v2877_v55  ;;  %v2889_v60 = vld [vmem:[%s3751_s2 + $0x38] sm:$0xff] }
  0xaa   : > { %2972 = vmatprep.subr.mxu1 %v3163_v0  ;;  %2974 = vmatprep.mubr.msk.f32.mxu1 %vm3164_vm0, %v3163_v0 }
  0xab   : > { %v1423_v17 = vadd.f32 %v1420_v6, %v1088_v43  ;;  %v1425_v18 = vadd.f32 %v1422_v14, %v1090_v48  ;;  %v1427_v19 = vpop.permute.xlu1 %1426  ;;  %2973 = vmatpush3.msra.mxu1 %v1270_v5  ;;  %v1431_v20 = vpop.permute.xlu0 %1430  ;;  %1307 = vmatpush1.msra.mxu0 %v1268_v4  ;;  %v2892_v48 = vld [vmem:[%s3750_s1 + $0x18] sm:$0x7] }
  0xac   : > { %v1434_v22 = vsel %vm1432_vm7, %v1427_v19, %v1429_v57  ;;  %v1433_v23 = vsel %vm1432_vm7, %v1429_v57, %v1431_v20  ;;  %v1435_v24 = vsel %vm1432_vm7, %v1431_v20, %v1427_v19  ;;  %1340 = vmatprep.mubr.f32.mxu0 %v3163_v0  ;;  %2977 = vmatprep.subr.mxu1 %v3163_v0 }
  0xad   : > { %v1454_v25 = vmul.f32 %v1442_v59, %v1434_v22  ;;  %v1606_v26 = vmul.f32 -1.0, %v1434_v22  ;;  %v1612_v27 = vadd.f32 %v1434_v22, %v902_v41  ;;  %v1456_v31 = vmul.f32 %v1450_v62, %v1435_v24  ;;  %2975 = vmatmul.mubr.msk.f32.vlgmr.msra.gmra.mxu1 %vm421_vm3, %v2881_v15  ;;  %2882 = vmatmul.mubr.msk.f32.vlgmr.msra.gmra.mxu0 %vm421_vm3, %v2881_v15 }
  0xae   : > { %v1607_v32 = vmul.f32 -1.0, %v1433_v23  ;;  %v1608_v33 = vmul.f32 -1.0, %v1435_v24  ;;  %v1613_v34 = vadd.f32 %v1433_v23, %v3397_v9  ;;  %v1614_v35 = vadd.f32 %v1435_v24, %v3438_v42  ;;  %2979 = vmatprep.mubr.msk.f32.mxu1 %vm3164_vm0, %v3163_v0  ;;  %1526 = vmatprep.mubr.f32.mxu0 %v3163_v0 }
  0xaf   : > { %v1620_v37 = vpop.permute.xlu1 %1619  ;;  %2978 = vmatpush3.msra.mxu1 %v1456_v31  ;;  %v1618_v38 = vpop.permute.xlu0 %1617  ;;  %v1455_v39 = vmul.f32 %v1446_v16, %v1433_v23  ;;  %v1609_v40 = vadd.f32 %v1606_v26, %v1423_v17  ;;  %v1817_v54 = vrot.slane %v2892_v48, %v3322_v13  ;;  %v1825_v55 = vrot.slane %v2892_v48, %v3320_v12 }
  0xb0   : > { %v1622_v41 = vsel %vm1621_vm8, %v1618_v38, %v1620_v37  ;;  %2982 = vmatprep.subr.mxu1 %v3163_v0  ;;  %v1610_v9 = vadd.f32 %v1607_v32, %v1424_v56  ;;  %v1611_v42 = vadd.f32 %v1608_v33, %v1425_v18  ;;  %v1821_v13 = vrot.slane %v2892_v48, %v3318_v11  ;;  %v2893_v11 = vld [vmem:[%s3751_s2 + $0x40] sm:$0xff] }
  0xb1   : > { %v1644_v43 = vmul.f32 %v1635_v21, %v1622_v41  ;;  %v1796_v44 = vmul.f32 2.0, %v1622_v41  ;;  %1492 = vmatprep.subr.mxu0 %v1455_v39  ;;  %2980 = vmatmul.mubr.msk.f32.vlgmr.msra.gmra.mxu1 %vm421_vm3, %v2885_v36 }
  0xb2   : > { %1493 = vmatpush1.msra.mxu0 %v1454_v25  ;;  %2984 = vmatprep.mubr.msk.f32.mxu1 %vm3164_vm0, %v3163_v0 }
  0xb3   : > { %v1799_v49 = vadd.f32 %v1796_v44, %v1613_v34  ;;  %2886 = vmatmul.mubr.msk.f32.vlgmr.msra.gmra.mxu0 %vm421_vm3, %v2885_v36  ;;  %v1804_v50 = vpop.permute.xlu1 %1803  ;;  %v1616_v51 = vpop.permute.xlu0 %1615  ;;  %1681 = vmatprep.subr.mxu0 %v1644_v43 }
  0xb4   : > { %v1623_v52 = vsel %vm1621_vm8, %v1616_v51, %v1618_v38  ;;  %v1624_v53 = vsel %vm1621_vm8, %v1620_v37, %v1616_v51  ;;  %1715 = vmatprep.mubr.f32.mxu0 %v3163_v0 }
  0xb5   : > { %v1643_v56 = vmul.f32 %v1631_v45, %v1623_v52  ;;  %v1645_v57 = vmul.f32 %v1639_v47, %v1624_v53  ;;  %v1795_v58 = vmul.f32 2.0, %v1623_v52  ;;  %v1797_v59 = vmul.f32 2.0, %v1624_v53 }
  0xb7   : > { %v1798_v61 = vadd.f32 %v1795_v58, %v1612_v27  ;;  %v1800_v62 = vadd.f32 %v1797_v59, %v1614_v35  ;;  %v1802_v63 = vpop.permute.xlu1 %1801  ;;  %2983 = vmatpush3.msra.mxu1 %v1645_v57  ;;  %v1806_v4 = vpop.permute.xlu0 %1805  ;;  %1682 = vmatpush1.msra.mxu0 %v1643_v56 }
  0xb8   : > { %v1809_v12 = vsel %vm1807_vm9, %v1802_v63, %v1804_v50  ;;  %v1808_v5 = vsel %vm1807_vm9, %v1804_v50, %v1806_v4  ;;  %v1810_v6 = vsel %vm1807_vm9, %v1806_v4, %v1802_v63  ;;  %2890 = vmatmul.mubr.msk.f32.vlgmr.msra.gmra.mxu0 %vm421_vm3, %v2889_v60  ;;  %2985 = vmatmul.mubr.msk.f32.vlgmr.msra.gmra.mxu1 %vm421_vm3, %v2889_v60 }
  0xb9   : > { %v1829_v14 = vmul.f32 %v1817_v54, %v1809_v12  ;;  %v1981_v15 = vadd.f32 %v1809_v12, %v1609_v40  ;;  %v1984_v16 = vadd.f32 %v1809_v12, %v1798_v61  ;;  %v1831_v17 = vmul.f32 %v1825_v55, %v1810_v6  ;;  %2987 = vmatprep.subr.mxu1 %v3163_v0 }
  0xba   : > { %v1982_v18 = vadd.f32 %v1808_v5, %v1610_v9  ;;  %v1983_v19 = vadd.f32 %v1810_v6, %v1611_v42  ;;  %v1985_v20 = vadd.f32 %v1808_v5, %v1799_v49  ;;  %v1986_v21 = vadd.f32 %v1810_v6, %v1800_v62  ;;  %2989 = vmatprep.mubr.msk.f32.mxu1 %vm3164_vm0, %v3163_v0 }
  0xbb   : > { %v2077_v10 = vmul.f32 %v1981_v15, %v1981_v15  ;;  %v2080_v22 = vmul.f32 %v1984_v16, %v1984_v16  ;;  %v1830_v23 = vmul.f32 %v1821_v13, %v1808_v5  ;;  %2988 = vmatpush3.msra.mxu1 %v1831_v17  ;;  %1901 = vmatprep.mubr.f32.mxu0 %v3163_v0 }
  0xbc   : > { %v2078_v24 = vmul.f32 %v1982_v18, %v1982_v18  ;;  %v2079_v25 = vmul.f32 %v1983_v19, %v1983_v19  ;;  %v2081_v26 = vmul.f32 %v1985_v20, %v1985_v20  ;;  %v2082_v27 = vmul.f32 %v1986_v21, %v1986_v21  ;;  %2990 = vmatmul.mubr.msk.f32.vlgmr.msra.gmra.mxu1 %vm421_vm3, %v2893_v11 }
  0xbd   : > { %v3554_v31 = vadd.f32 %v2080_v22, %v2077_v10  ;;  %1867 = vmatprep.subr.mxu0 %v1830_v23  ;;  %2992 = vmatprep.subr.mxu1 %v3163_v0 }
  0xbe   : > { %v3557_v32 = vadd.f32 %v2081_v26, %v2078_v24  ;;  %v3559_v33 = vadd.f32 %v2082_v27, %v2079_v25  ;;  %1868 = vmatpush1.msra.mxu0 %v1829_v14  ;;  %2994 = vmatprep.mubr.msk.f32.mxu1 %vm3164_vm0, %v3163_v0 }
  0xbf   : > { %2894 = vmatmul.mubr.msk.f32.vlgmr.msra.gmra.mxu0 %vm421_vm3, %v2893_v11  ;;  %3073 = vrsqrt.f32 %v3554_v31  ;;  %vm2088_vm11 = vcmp.eq.f32.partialorder %v3554_v31, inf  ;;  %vm2090_vm14 = vcmp.eq.f32.partialorder %v3554_v31, 0.0 }
  0xc0   : > { %2182 = vmatprep.mubr.f32.mxu0 %v3163_v0  ;;  %3075 = vrsqrt.f32 %v3557_v32  ;;  %vm2095_vm12 = vcmp.eq.f32.partialorder %v3557_v32, inf  ;;  %vm2102_vm13 = vcmp.eq.f32.partialorder %v3559_v33, inf  ;;  %vm2097_vm15 = vcmp.eq.f32.partialorder %v3557_v32, 0.0 }
  0xc1   : > { %3077 = vrsqrt.f32 %v3559_v33  ;;  %vm2104_vm1 = vcmp.eq.f32.partialorder %v3559_v33, 0.0 }
 0x155   : > { %v491_v34 = vpop.f32.mrf.mxu0  ;;  %v562_v35 = vpop.f32.mrf.mxu1 }
 0x157   : > { %v493_v36 = vpop.f32.mrf.mxu0  ;;  %v2951_v37 = vpop.f32.mrf.mxu1 }
 0x159   : > { %v635_v38 = vpop.f32.mrf.mxu0  ;;  %v706_v39 = vpop.f32.mrf.mxu1 }
 0x15a   : > { %v707_v50 = vadd.f32 %v706_v39, %v562_v35  ;;  %v636_v60 = vadd.f32 %v635_v38, %v491_v34  ;;  %v1991_v34 = vpop.permute.xlu0 %1990 }
 0x15b   : > { %v2956_v40 = vpop.f32.mrf.mxu1  ;;  %v637_v41 = vpop.f32.mrf.mxu0 }
 0x15c   : > { %v638_v13 = vadd.f32 %v637_v41, %v493_v36  ;;  %v2001_v36 = vpop.permute.xlu1 %2000 }
 0x160   : > { %v818_v9 = vpop.f32.mrf.mxu0  ;;  %v889_v42 = vpop.f32.mrf.mxu1 }
 0x161   : > { %v895_v55 = vadd.f32 %v889_v42, %v707_v50  ;;  %v893_v12 = vadd.f32 %v818_v9, %v636_v60 }
 0x162   : > { %v820_v43 = vpop.f32.mrf.mxu0  ;;  %v2961_v44 = vpop.f32.mrf.mxu1 }
 0x163   : > { %v894_v6 = vadd.f32 %v820_v43, %v638_v13 }
 0x164   : > { %v1078_v45 = vpop.f32.mrf.mxu1 }
 0x165   : > { %v1007_v47 = vpop.f32.mrf.mxu0  ;;  %v1084_v61 = vadd.f32 %v1078_v45, %v895_v55 }
 0x166   : > { %v2966_v48 = vpop.f32.mrf.mxu1  ;;  %v1082_v14 = vadd.f32 %v1007_v47, %v893_v12  ;;  %v3589_v12 = vld [vmem:[%s3756_s7 + $0x58] sm:$0xff] }
 0x167   : > { %v1009_v49 = vpop.f32.mrf.mxu0  ;;  %v2011_v48 = vpop.permute.xlu1 %2010 }
 0x168   : > { %v1083_v17 = vadd.f32 %v1009_v49, %v894_v6 }
 0x169   : > { %v1233_v51 = vpop.f32.mrf.mxu1  ;;  %v1162_v52 = vpop.f32.mrf.mxu0 }
 0x16a   : > { %v1239_v5 = vadd.f32 %v1233_v51, %v1084_v61  ;;  %v1237_v11 = vadd.f32 %v1162_v52, %v1082_v14 }
 0x16b   : > { %v2971_v53 = vpop.f32.mrf.mxu1  ;;  %v1164_v54 = vpop.f32.mrf.mxu0 }
 0x16c   : > { %v1238_v21 = vadd.f32 %v1164_v54, %v1083_v17 }
 0x16d   : > { %v1413_v56 = vpop.f32.mrf.mxu1  ;;  %v1342_v57 = vpop.f32.mrf.mxu0 }
 0x16e   : > { %v1419_v16 = vadd.f32 %v1413_v56, %v1239_v5  ;;  %v1417_v10 = vadd.f32 %v1342_v57, %v1237_v11 }
 0x16f   : > { %v2976_v58 = vpop.f32.mrf.mxu1  ;;  %v1344_v59 = vpop.f32.mrf.mxu0 }
 0x170   : > { %v1418_v25 = vadd.f32 %v1344_v59, %v1238_v21 }
 0x171   : > { %v1599_v62 = vpop.f32.mrf.mxu1 }
 0x172   : > { %v1605_v20 = vadd.f32 %v1599_v62, %v1419_v16  ;;  %v328_v62 = vadd.f32 %v3412_v28, %v3416_v29 }
 0x173   : > { %v1528_v63 = vpop.f32.mrf.mxu0  ;;  %v2981_v4 = vpop.f32.mrf.mxu1 }
 0x174   : > { %v1603_v26 = vadd.f32 %v1528_v63, %v1417_v10  ;;  %v329_v4 = vadd.f32 %v328_v62, %v3442_v46 }
 0x175   : > { %v1530_v15 = vpop.f32.mrf.mxu0 }
 0x176   : > { %v1604_v37 = vadd.f32 %v1530_v15, %v1418_v25 }
 0x178   : > { %v1717_v18 = vpop.f32.mrf.mxu0  ;;  %v1788_v19 = vpop.f32.mrf.mxu1 }
 0x179   : > { %v1794_v23 = vadd.f32 %v1788_v19, %v1605_v20  ;;  %v1792_v38 = vadd.f32 %v1717_v18, %v1603_v26 }
 0x17a   : > { %v2986_v22 = vpop.f32.mrf.mxu1  ;;  %v1719_v24 = vpop.f32.mrf.mxu0 }
 0x17b   : > { %v1793_v9 = vadd.f32 %v1719_v24, %v1604_v37 }
 0x17c   : > { %v1974_v27 = vpop.f32.mrf.mxu1 }
 0x17d   : > { %v1980_v35 = vadd.f32 %v1974_v27, %v1794_v23 }
 0x17e   : > { %v2991_v39 = vpop.f32.mrf.mxu1 }
 0x17f   : > { %v1903_v40 = vpop.f32.mrf.mxu0  ;;  %v1995_v41 = vadd.f32 %v1991_v34, %v1980_v35 }
 0x180   : > { %v1978_v42 = vadd.f32 %v1903_v40, %v1792_v38 }
 0x181   : > { %v1905_v43 = vpop.f32.mrf.mxu0  ;;  %v2005_v47 = vmul.f32 %v2001_v36, %v1995_v41 }
 0x182   : > { %v1993_v44 = vadd.f32 %v1991_v34, %v1978_v42  ;;  %v1979_v45 = vadd.f32 %v1905_v43, %v1793_v9  ;;  %v2091_v42 = vand.u32 2147483648, %v3554_v31  ;;  %v2098_v43 = vand.u32 2147483648, %v3557_v32 }
 0x183   : > { %v3567_v53 = vadd.f32 %v2011_v48, %v2005_v47 }
 0x184   : > { %v1994_v49 = vadd.f32 %v1991_v34, %v1979_v45  ;;  %v2003_v50 = vmul.f32 %v2001_v36, %v1993_v44  ;;  %v3074_v34 = vpop.eup %3073  ;;  %v2105_v44 = vand.u32 2147483648, %v3559_v33 }
 0x185   : > { %v2018_v57 = vmax.f32 %v3567_v53, 0.0  ;;  %v3076_v35 = vpop.eup %3075  ;;  %v2087_v37 = vmul.f32 %v3074_v34, %v3554_v31 }
 0x186   : > { %v2004_v51 = vmul.f32 %v2001_v36, %v1994_v49  ;;  %v3565_v52 = vadd.f32 %v2011_v48, %v2003_v50  ;;  %v3078_v36 = vpop.eup %3077  ;;  %v2094_v38 = vmul.f32 %v3076_v35, %v3557_v32 }
 0x187   : > { %v2023_v60 = vmul.f32 %v2018_v57, %v3419_v30  ;;  %v2101_v39 = vmul.f32 %v3078_v36, %v3559_v33  ;;  %v2089_v40 = vsel %vm2088_vm11, %v3554_v31, %v2087_v37 }
 0x188   : > { %v3569_v54 = vadd.f32 %v2011_v48, %v2004_v51  ;;  %v2016_v55 = vmax.f32 %v3565_v52, 0.0  ;;  %v2096_v41 = vsel %vm2095_vm12, %v3557_v32, %v2094_v38  ;;  %v2092_v47 = vsel %vm2090_vm14, %v2091_v42, %v2089_v40  ;;  %v2437_v42 = vld [vmem:[%s3755_s6] sm:$0xff] }
 0x189   : > { %v2103_v9 = vsel %vm2102_vm13, %v3559_v33, %v2101_v39  ;;  %v2099_v48 = vsel %vm2097_vm15, %v2098_v43, %v2096_v41 }
 0x18a   : > { %v2017_v56 = vmax.f32 %v3569_v54, 0.0  ;;  %v2021_v58 = vmul.f32 %v2016_v55, %v3395_v8  ;;  %v2106_v49 = vsel %vm2104_vm1, %v2105_v44, %v2103_v9 }
 0x18c   : > { %v2022_v59 = vmul.f32 %v2017_v56, %v3392_v7 }
 0x18e   : > { %v2024_v61 = vadd.f32 %v2022_v59, %v2021_v58 }
 0x190   : > { %v2025_v63 = vadd.f32 %v2024_v61, %v2023_v60  ;;  %v2114_v60 = vld [vmem:[%s3753_s4] sm:$0xff] }
 0x192   : > { %2026 = vadd.xlane.f32.xlu0 %v2025_v63  ;;  %v2113_v63 = vld [vmem:[%s3752_s3] sm:$0xff] }
 0x196   : > { %330 = vadd.xlane.f32.xlu0 %v329_v4 }
 0x21b   : > { %v2027_v13 = vpop.xlane.xlu0 %2026 }
 0x21c   : > { %v3591_v5 = vmul.f32 0.00390625, %v2027_v13 }
 0x21e   : > { %v2029_v6 = vmul.f32 %v3589_v12, %v3591_v5 }
 0x21f   : > { %v331_v14 = vpop.xlane.xlu0 %330 }
 0x220   : > { %v332_v15 = vmul.f32 0.00390625, %v331_v14  ;;  %v2031_v28 = vsel %vm2030_vm10, %v2029_v6, 0.0 }
 0x221   : > { %2032 = vadd.xlane.f32.xlu1 %v2031_v28  ;;  %v2906_v28 = vld [vmem:[%s3756_s7 + $0x30] sm:$0xff] }
 0x222   : > { %v3597_v29 = vsub.f32 %v3279_v2, %v332_v15  ;;  %v334_v46 = vsub.f32 %v3283_v3, %v332_v15  ;;  %v335_v16 = vsub.f32 %v3277_v1, %v332_v15  ;;  %v2905_v2 = vld [vmem:[%s3756_s7 + $0x28] sm:$0xff] }
 0x224   : > { %v336_v17 = vmul.f32 %v3597_v29, %v3597_v29  ;;  %v337_v11 = vmul.f32 %v334_v46, %v334_v46  ;;  %v338_v18 = vmul.f32 %v335_v16, %v335_v16 }
 0x226   : > { %v339_v19 = vmul.f32 %v336_v17, %v3395_v8  ;;  %v340_v20 = vmul.f32 %v337_v11, %v3392_v7  ;;  %v341_v21 = vmul.f32 %v338_v18, %v3419_v30 }
 0x228   : > { %v342_v10 = vadd.f32 %v340_v20, %v339_v19 }
 0x22a   : > { %v343_v22 = vadd.f32 %v342_v10, %v341_v21 }
 0x22c   : > { %344 = vadd.xlane.f32.xlu0 %v343_v22 }
 0x242   : > { %2407 = vperm.xlu0 %3071, %v2905_v2  }
 0x2aa   : > { %v2033_v1 = vpop.xlane.xlu1 %2032 }
 0x2ab   : > { %v2034_v3 = vrot.slane %v2033_v1, 4 }
 0x2ad   : > { %v2035_v23 = vadd.f32 %v2034_v3, %v2033_v1 }
 0x2af   : > { %v2036_v8 = vrot.slane %v2035_v23, 2 }
 0x2b1   : > { %v2037_v7 = vadd.f32 %v2036_v8, %v2035_v23 }
 0x2b3   : > { %v2038_v30 = vrot.slane %v2037_v7, 1 }
 0x2b5   : > { %v345_v24 = vpop.xlane.xlu0 %344  ;;  %v2039_v25 = vadd.f32 %v2038_v30, %v2037_v7 }
 0x2b6   : > { %v346_v26 = vmul.f32 0.00390625, %v345_v24 }
 0x2b7   : > { %3014 = vpush %v2039_v25 }
 0x2b8   : > { %v347_v27 = vadd.f32 1e-05, %v346_v26 }
 0x2ba   : > { %3079 = vrsqrt.f32 %v347_v27 }
 0x2bd   : > { %v2408_v7 = vpop.permute.xlu0 %2407 }
 0x2c7   : > { %v3080_v45 = vpop.eup %3079 }
 0x2c8   : > { %v2108_v50 = vmul.f32 %v3080_v45, %v2099_v48  ;;  %v2109_v51 = vmul.f32 %v3080_v45, %v2106_v49  ;;  %v2107_v58 = vmul.f32 %v3080_v45, %v2092_v47  ;;  %v350_v32 = vmul.f32 %v3080_v45, %v334_v46 }
 0x2c9   : > { %v351_v61 = vmul.f32 %v3080_v45, %v335_v16  ;;  %v349_v62 = vmul.f32 %v3080_v45, %v3597_v29  ;;  %v2907_v29 = vld [vmem:[%s3756_s7 + $0x38] sm:$0xff] }
 0x2ca   : > { %3081 = vtanh.f32 %v2108_v50  ;;  %v2899_v50 = vld [vmem:[%s3756_s7 + $0x18] sm:$0xff] }
 0x2cb   : > { %3083 = vtanh.f32 %v2109_v51 }
 0x2cc   : > { %3085 = vtanh.f32 %v2107_v58  ;;  %v2900_v58 = vld [vmem:[%s3756_s7 + $0x20] sm:$0xff] }
 0x2d7   : > { %v3082_v59 = vpop.eup %3081 }
 0x2d8   : > { %v3084_v31 = vpop.eup %3083  ;;  %2148 = vmatprep.subr.mxu0 %v3082_v59 }
 0x2d9   : > { %v3086_v33 = vpop.eup %3085  ;;  %2993 = vmatpush3.msra.mxu1 %v3084_v31 }
 0x2da   : > { %2149 = vmatpush1.msra.mxu0 %v3086_v33  ;;  %2995 = vmatmul.mubr.msk.f32.vlgmr.msra.gmra.mxu1 %vm421_vm3, %v2114_v60 }
 0x2db   : > { %2901 = vmatmul.mubr.msk.f32.vlgmr.msra.gmra.mxu0 %vm421_vm3, %v2114_v60  ;;  %2997 = vmatprep.subr.mxu1 %v3163_v0  ;;  %v2913_v60 = vld [vmem:[%s3756_s7 + $0x48] sm:$0xff] }
 0x2dc   : > { %2292 = vmatprep.subr.mxu0 %v350_v32  ;;  %2998 = vmatpush3.msra.mxu1 %v351_v61 }
 0x2dd   : > { %2999 = vmatprep.mubr.msk.f32.mxu1 %vm3164_vm0, %v3163_v0  ;;  %2293 = vmatpush1.msra.mxu0 %v349_v62 }
 0x2de   : > { %2326 = vmatprep.mubr.f32.mxu0 %v3163_v0  ;;  %3000 = vmatmul.mubr.msk.f32.vlgmr.msra.gmra.mxu1 %vm421_vm3, %v2113_v63 }
 0x2df   : > { %2903 = vmatmul.mubr.msk.f32.vlgmr.msra.gmra.mxu0 %vm421_vm3, %v2113_v63  ;;  %3002 = vmatprep.subr.mxu1 %v3163_v0 }
 0x2e0   : > { %3004 = vmatprep.mubr.msk.f32.mxu1 %vm3164_vm0, %v3163_v0  ;;  %2505 = vmatprep.mubr.f32.mxu0 %v3163_v0 }
 0x2e8   : > { %s3015_s12 = spop %3014 }
 0x2e9   : > { %s2041_s13 = smul.f32 0.25, %s3015_s12 }
 0x2eb   : > { %v2042_v4 = vstv %s2041_s13 }
 0x2ec   : > { %v3647_v13 = vsub.f32 %v3591_v5, %v2042_v4  ;;  %v2912_v5 = vld [vmem:[%s3756_s7 + $0x40] sm:$0xff] }
 0x2ed   : > { %v2436_v4 = vld [vmem:[%s3754_s5] sm:$0xff] }
 0x2ee   : > { %v2044_v6 = vmul.f32 %v3589_v12, %v3647_v13  ;;  %v2914_v12 = vld [vmem:[%s3756_s7 + $0x50] sm:$0xff] }
 0x2f0   : > { %v2045_v14 = vmul.f32 %v2044_v6, %v2044_v6 }
 0x2f2   : > { %v2046_v15 = vsel %vm2030_vm10, %v2045_v14, 0.0 }
 0x2f3   : > { %2047 = vadd.xlane.f32.xlu1 %v2046_v15 }
 0x304   : > { %2417 = vperm.xlu1 %3072, %v2906_v28  }
 0x308   : > { %2427 = vperm.xlu1 %3072, %v2907_v29  }
 0x30c   : > { %2730 = vperm.xlu1 %3072, %v2912_v5  }
 0x310   : > { %2750 = vperm.xlu1 %3072, %v2914_v12  }
 0x37c   : > { %v2048_v46 = vpop.xlane.xlu1 %2047 }
 0x37d   : > { %v2049_v16 = vrot.slane %v2048_v46, 4 }
 0x37f   : > { %v2050_v17 = vadd.f32 %v2049_v16, %v2048_v46 }
 0x380   : > { %v2418_v1 = vpop.permute.xlu1 %2417 }
 0x381   : > { %v2051_v11 = vrot.slane %v2050_v17, 2 }
 0x383   : > { %v2052_v18 = vadd.f32 %v2051_v11, %v2050_v17 }
 0x384   : > { %v2428_v36 = vpop.permute.xlu1 %2427 }
 0x385   : > { %v2053_v19 = vrot.slane %v2052_v18, 1 }
 0x387   : > { %v2054_v20 = vadd.f32 %v2053_v19, %v2052_v18 }
 0x389   : > { %3016 = vpush %v2054_v20 }
 0x39a   : > { %v2255_v21 = vpop.f32.mrf.mxu1 }
 0x39b   : > { %v2184_v10 = vpop.f32.mrf.mxu0 }
 0x39c   : > { %v2996_v22 = vpop.f32.mrf.mxu1 }
 0x39d   : > { %v2186_v2 = vpop.f32.mrf.mxu0 }
 0x39e   : > { %v2399_v3 = vpop.f32.mrf.mxu1 }
 0x39f   : > { %v2400_v23 = vadd.f32 %v2399_v3, %v2255_v21  ;;  %v2328_v8 = vpop.f32.mrf.mxu0 }
 0x3a0   : > { %v2329_v30 = vadd.f32 %v2328_v8, %v2184_v10  ;;  %v3001_v24 = vpop.f32.mrf.mxu1 }
 0x3a1   : > { %v2412_v25 = vadd.f32 %v2408_v7, %v2400_v23  ;;  %v2330_v26 = vpop.f32.mrf.mxu0 }
 0x3a2   : > { %v2410_v27 = vadd.f32 %v2408_v7, %v2329_v30  ;;  %v2331_v34 = vadd.f32 %v2330_v26, %v2186_v2 }
 0x3a3   : > { %v2422_v35 = vmul.f32 %v2418_v1, %v2412_v25 }
 0x3a4   : > { %v2420_v37 = vmul.f32 %v2418_v1, %v2410_v27  ;;  %v2411_v38 = vadd.f32 %v2408_v7, %v2331_v34 }
 0x3a5   : > { %v3664_v39 = vadd.f32 %v2428_v36, %v2422_v35 }
 0x3a6   : > { %v2421_v40 = vmul.f32 %v2418_v1, %v2411_v38  ;;  %v3667_v9 = vadd.f32 %v2428_v36, %v2420_v37 }
 0x3a7   : > { %v2435_v41 = vmax.f32 %v3664_v39, 0.0 }
 0x3a8   : > { %v3672_v43 = vadd.f32 %v2428_v36, %v2421_v40  ;;  %v2433_v45 = vmax.f32 %v3667_v9, 0.0 }
 0x3a9   : > { %3003 = vmatpush3.msra.mxu1 %v2435_v41 }
 0x3aa   : > { %v2434_v44 = vmax.f32 %v3672_v43, 0.0  ;;  %3005 = vmatmul.mubr.msk.f32.vlgmr.msra.gmra.mxu1 %vm421_vm3, %v2437_v42  ;;  %3007 = vmatprep.subr.mxu1 %v3163_v0 }
 0x3ab   : > { %3009 = vmatprep.mubr.msk.f32.mxu1 %vm3164_vm0, %v3163_v0 }
 0x3ac   : > { %2471 = vmatprep.subr.mxu0 %v2434_v44 }
 0x3ad   : > { %2472 = vmatpush1.msra.mxu0 %v2433_v45 }
 0x3ae   : > { %2908 = vmatmul.mubr.msk.f32.vlgmr.msra.gmra.mxu0 %vm421_vm3, %v2437_v42 }
 0x3af   : > { %2649 = vmatprep.mubr.f32.mxu0 %v3163_v0 }
 0x3ba   : > { %s3017_s10 = spop %3016 }
 0x3bb   : > { %s2056_s12 = smul.f32 0.25, %s3017_s10 }
 0x3bc   : > { %s3012_s10 = smul.u32 24, %s296_s26 }
 0x3bd   : > { %s2057_s13 = sadd.f32 1e-05, %s2056_s12  ;;  %s3020_s12 = smul.u32 384, %s3241_s9 }
 0x3be   : > { %s2784_s9 = scalar_lea.sflag [#allocation3], %s296_s26 }
 0x3bf   : > { %v2058_v47 = vstv %s2057_s13  ;;  %s298_s13 = scalar_lea.vmem [#allocation2], %s3012_s10  ;;  %s2796_s20 = scalar_lea.hbm %s3757_s8, %s3020_s12 }
 0x3c0   : > { %3087 = vrsqrt.f32 %v2058_v47 }
 0x3cd   : > { %v3088_v48 = vpop.eup %3087 }
 0x3ce   : > { %3018 = vpush %v3088_v48 }
 0x3ff   : > { %s3019_s17 = spop %3018 }
 0x400   : > { %v2061_v49 = vstv %s3019_s17  ;;  %s2798_s17 = sshll.u32 %s298_s13, 4  ;;  %s2799_s17 = int_to_ptr.vmem [resolvable:$true] %s2798_s17 }
 0x401   : > { %v2062_v51 = vmul.f32 %v2061_v49, %v3647_v13  ;;  %s3101_s21 = scalar_lea.vmem %s2799_s17, 384  ;;  %p3108_p0 = scmp.lt.s32.totalorder %s2799_s17, %s3106_s23 }
 0x402   : > { %p3102_p11 = scmp.ne.s32.totalorder %s2799_s17, %s3101_s21  ;;  %p3109_p1 = scmp.lt.s32.totalorder %s3107_s24, %s3101_s21 }
 0x403   : > { %v2065_v0 = vmul.f32 %v2899_v50, %v2062_v51 }
 0x404   : > { %p3103_p12 = pnand %p3102_p11, %p3258_p5  ;;  %p3110_p2 = por %p3109_p1, %p3108_p0 }
 0x405   : > { %v2068_v59 = vadd.f32 %v2900_v58, %v2065_v0 }
 0x406   : > { %p3104_p13 = pneg %p3103_p12 }
 0x407   : > { %2071 = vperm.xlu0 %3071, %v2068_v59  }
 0x408   : > { %p3111_p3 = pnand %p3110_p2, %p3104_p13 }
 0x40b   : > { %2740 = vperm.xlu0 %3071, %v2913_v60  }
 0x46a   : > { %v2578_v31 = vpop.f32.mrf.mxu1 }
 0x46c   : > { %v3006_v32 = vpop.f32.mrf.mxu1 }
 0x46e   : > { %v2507_v13 = vpop.f32.mrf.mxu0 }
 0x470   : > { %v2509_v52 = vpop.f32.mrf.mxu0 }
 0x482   : > { %v2072_v61 = vpop.permute.xlu0 %2071 }
 0x483   : > { %v2074_v33 = vmul.f32 %v2072_v61, %v2016_v55  ;;  %v2075_v62 = vmul.f32 %v2072_v61, %v2017_v56  ;;  %v2076_v63 = vmul.f32 %v2072_v61, %v2018_v57  ;;  %v2731_v55 = vpop.permute.xlu1 %2730 }
 0x485   : > { %2615 = vmatprep.subr.mxu0 %v2075_v62  ;;  %3008 = vmatpush3.msra.mxu1 %v2076_v63  ;;  %v2776_v30 = vadd.f32 %v2435_v41, %v2076_v63  ;;  %v2774_v25 = vadd.f32 %v2433_v45, %v2074_v33  ;;  %v2775_v34 = vadd.f32 %v2434_v44, %v2075_v62 }
 0x486   : > { %2616 = vmatpush1.msra.mxu0 %v2074_v33  ;;  %3010 = vmatmul.mubr.msk.f32.vlgmr.msra.gmra.mxu1 %vm421_vm3, %v2436_v4  ;;  %v2741_v28 = vpop.permute.xlu0 %2740 }
 0x487   : > { %2910 = vmatmul.mubr.msk.f32.vlgmr.msra.gmra.mxu0 %vm421_vm3, %v2436_v4  ;;  %v2751_v46 = vpop.permute.xlu1 %2750 }
 0x546   : > { %v2722_v6 = vpop.f32.mrf.mxu1 }
 0x547   : > { %v2723_v54 = vadd.f32 %v2722_v6, %v2578_v31  ;;  %v2651_v56 = vpop.f32.mrf.mxu0 }
 0x548   : > { %v2652_v14 = vadd.f32 %v2651_v56, %v2507_v13  ;;  %v3011_v53 = vpop.f32.mrf.mxu1 }
 0x549   : > { %v2735_v57 = vadd.f32 %v2731_v55, %v2723_v54  ;;  %v2653_v15 = vpop.f32.mrf.mxu0 }
 0x54a   : > { %v2733_v29 = vadd.f32 %v2731_v55, %v2652_v14  ;;  %v2654_v5 = vadd.f32 %v2653_v15, %v2509_v52 }
 0x54b   : > { %v2745_v12 = vmul.f32 %v2741_v28, %v2735_v57 }
 0x54c   : > { %v2743_v16 = vmul.f32 %v2741_v28, %v2733_v29  ;;  %v2734_v17 = vadd.f32 %v2731_v55, %v2654_v5 }
 0x54d   : > { %v2755_v11 = vadd.f32 %v2751_v46, %v2745_v12 }
 0x54e   : > { %v2753_v18 = vadd.f32 %v2751_v46, %v2743_v16  ;;  %v2744_v19 = vmul.f32 %v2741_v28, %v2734_v17 }
 0x54f   : > { %v2917_v20 = vmul.f32 -1.442695, %v2755_v11 }
 0x550   : > { %v2915_v21 = vmul.f32 -1.442695, %v2753_v18  ;;  %v2754_v10 = vadd.f32 %v2751_v46, %v2744_v19 }
 0x551   : > { %3089 = vpow2.f32 %v2917_v20 }
 0x552   : > { %3091 = vpow2.f32 %v2915_v21  ;;  %v2916_v22 = vmul.f32 -1.442695, %v2754_v10 }
 0x554   : > { %3093 = vpow2.f32 %v2916_v22 }
 0x55e   : > { %v3090_v2 = vpop.eup %3089 }
 0x55f   : > { %v3092_v1 = vpop.eup %3091  ;;  %v2767_v3 = vadd.f32 1.0, %v3090_v2 }
 0x560   : > { %v2765_v23 = vadd.f32 1.0, %v3092_v1 }
 0x561   : > { %v3094_v8 = vpop.eup %3093  ;;  %3095 = vrcp.f32 %v2767_v3 }
 0x562   : > { %3097 = vrcp.f32 %v2765_v23  ;;  %v2766_v7 = vadd.f32 1.0, %v3094_v8 }
 0x564   : > { %3099 = vrcp.f32 %v2766_v7 }
 0x56e   : > { %v3096_v24 = vpop.eup %3095 }
 0x56f   : > { %v3098_v26 = vpop.eup %3097  ;;  %v2779_v27 = vmul.f32 %v3096_v24, %v2776_v30 }
 0x570   : > { %v2777_v35 = vmul.f32 %v3098_v26, %v2774_v25 }
 0x571   : > { %v3100_v36 = vpop.eup %3099  ;;  %2782 = vst [vmem:[%s298_s13 + $0x10] sm:$0xff] %v2779_v27 }
 0x572   : > { %v2778_v37 = vmul.f32 %v3100_v36, %v2775_v34  ;;  %2780 = vst [vmem:[%s298_s13] sm:$0xff] %v2777_v35 }
 0x574   : > { %2781 = vst [vmem:[%s298_s13 + $0x8] sm:$0xff] %v2778_v37 }
 0x575   : > { %3114 = shalt.err (!%p3111_p3)
}
 0x576   : > { %s3115_s25 = scalar_lea.hbm %s2796_s20, 384  ;;  %s3119_s12 = scalar_lea.hbm %s3757_s8, 768 }
 0x577   : > { %p3116_p4 = scmp.ne.s32.totalorder %s2796_s20, %s3115_s25  ;;  %p3120_p9 = scmp.lt.s32.totalorder %s2796_s20, %s3757_s8 }
 0x578   : > { %p3121_p10 = scmp.lt.s32.totalorder %s3119_s12, %s3115_s25 }
 0x579   : > { %p3117_p7 = pnand %p3116_p4, %p3258_p5 }
 0x57a   : > { %p3122_p11 = por %p3121_p10, %p3120_p9 }
 0x57b   : > { %p3118_p8 = pneg %p3117_p7 }
 0x57d   : > { %p3123_p12 = pnand %p3122_p11, %p3118_p8 }
 0x57f   : > { %3126 = shalt.err (!%p3123_p12)
}
 0x580   : > { %3021 = dma.vmem_to_hbm [thread:$0]  (%p3258_p5), %s2799_s17, 384, %s2796_s20, %s2784_s9  }
 0x581 PF: > { %p3027_p13 = scmp.ge.s32.totalorder %s3161_s30, 2  ;;  %s2810_s19 = sand.u32 1, %s3149_s27  }
 0x582   : > { %s2811_s21 = scalar_lea.sflag [#allocation3], %s2810_s19 }
 0x583   : > { %p3024_p0 = pnand %p3027_p13, %p3262_p6 }
 0x585   : > { %p3025_p1 = pneg %p3024_p0 }
 0x587   : > { %3144 = dma.done.wait (%p3025_p1), %s2811_s21, 384  }
 0x588   : > { %3146 = vsyncadd (%p3025_p1), %s2811_s21, 4294966912  ;;  %p18_p2 = scmp.ge.s32.totalorder %s3245_s11, 4   ;;  %s3760_s27 = smov %s3153_s28 }
 0x589   : > { %s3761_s28 = smov %s3157_s29  ;;  %s3762_s29 = smov %s3256_s14 }
 0x58a   : > { %s3763_s30 = smov %s3245_s11  ;;  %20 = sbr.rel (!%p18_p2) target bundleno = 3 (0x3), region = 114 }
 0x58f   :  { %2816 = vsyncpa [#allocation3], 1 }
 0x590   :  { %2818 = vsyncpa [#allocation3 + $0x1], 1 }

</bundles_post_ra>
